<compile_context>
chip_gen: v7x
topology: tpu7x:2x2x1
jax: 0.10.0
libtpu: 0.0.40
codegen_flags: <defaults>
</compile_context>

<pallas_src>
import jax
import jax.numpy as jnp
from jax.experimental import pallas as pl
from jax.experimental.pallas import tpu as pltpu


def _round_up(x, m):
    return ((x + m - 1) // m) * m


def _gather_kernel(tok_ref, tab_ref, out_ref):
    # tok_ref: (TILE, 1) int32  | tab_ref: (n_tok_pad, d_pad) f32 (proj+scale pre-folded)
    # out_ref: (TILE, d_pad) f32  — lane-dense (d_pad % 128 == 0)
    tok = tok_ref[...]                                               # (TILE, 1)
    tile = tok.shape[0]
    n_tok_pad = tab_ref.shape[0]
    iota = jax.lax.broadcasted_iota(jnp.int32, (tile, n_tok_pad), 1)  # (TILE, n_tok_pad)
    onehot = (iota == tok).astype(jnp.float32)
    # HIGHEST precision => exact gather (one-hot rows select single table rows).
    out_ref[...] = jnp.dot(
        onehot,
        tab_ref[...],
        precision=jax.lax.Precision.HIGHEST,
        preferred_element_type=jnp.float32,
    )


def adaptive_embedding(inp, emb_table, emb_proj=None, *, tile=512):
    """inp: (B, S) int32 token ids. Returns (B, S, d_proj) float32."""
    B, S = inp.shape
    n_token, d_embed = emb_table.shape
    d_proj = d_embed if emb_proj is None else emb_proj.shape[0]
    scale = jnp.float32(float(d_proj) ** 0.5)

    # Fold optional projection and the sqrt(d_proj) scale into one lookup table
    # (one-time wrapper cost, amortized over all tokens).
    table = emb_table.astype(jnp.float32)
    if emb_proj is not None:
        table = jnp.dot(
            table,
            emb_proj.astype(jnp.float32).T,
            precision=jax.lax.Precision.HIGHEST,
        )
    table = table * scale                                            # (n_token, d_proj)

    # Lane-dense padding: features and vocab (matmul K) -> multiples of 128.
    d_pad = _round_up(d_proj, 128)
    n_tok_pad = _round_up(n_token, 128)
    table = jnp.pad(table, ((0, n_tok_pad - n_token), (0, d_pad - d_proj)))

    # Flatten token ids and pick a large (but not wasteful) tile.
    flat = inp.reshape(-1).astype(jnp.int32)
    n = flat.shape[0]
    tile = _round_up(max(8, tile), 8)
    tile = min(tile, _round_up(n, 8))
    n_pad = _round_up(n, tile)
    flat = jnp.pad(flat, (0, n_pad - n))
    tok2d = flat.reshape(n_pad, 1)

    grid = (n_pad // tile,)
    out_flat = pl.pallas_call(
        _gather_kernel,
        out_shape=jax.ShapeDtypeStruct((n_pad, d_pad), jnp.float32),
        grid_spec=pltpu.PrefetchScalarGridSpec(
            num_scalar_prefetch=0,
            grid=grid,
            in_specs=[
                pl.BlockSpec((tile, 1), lambda i: (i, 0)),
                pl.BlockSpec((n_tok_pad, d_pad), lambda i: (0, 0)),  # resident table
            ],
            out_specs=pl.BlockSpec((tile, d_pad), lambda i: (i, 0)),
        ),
        compiler_params=pltpu.CompilerParams(
            dimension_semantics=("parallel",),
        ),
    )(tok2d, table)

    return out_flat[:n, :d_proj].reshape(B, S, d_proj)


if __name__ == "__main__":
    key = jax.random.PRNGKey(0)
    k_emb, k_tok, k_emb2, k_proj2, k_tok2 = jax.random.split(key, 5)

    # Config from the module docstring: n_token=28, d_embed=d_proj=500, div_val=1, cutoffs=[].
    n_token, d_embed, d_proj = 28, 500, 500
    B, S = 2, 8
    emb_table = jax.random.normal(k_emb, (n_token, d_embed), dtype=jnp.float32)
    inp = jax.random.randint(k_tok, (B, S), 0, n_token, dtype=jnp.int32)

    out = adaptive_embedding(inp, emb_table)          # d_proj == d_embed -> no projection
    out = jax.block_until_ready(out)
    ref = emb_table[inp] * (d_proj ** 0.5)
    assert out.shape == (B, S, d_proj), out.shape
    assert jnp.allclose(out, ref, atol=1e-4, rtol=1e-4), "mismatch (lookup path)"

    # Also exercise the d_proj != d_embed projection path (pre-combined in the wrapper).
    d_embed2, d_proj2 = 32, 48
    emb_table2 = jax.random.normal(k_emb2, (n_token, d_embed2), dtype=jnp.float32)
    proj2 = jax.random.normal(k_proj2, (d_proj2, d_embed2), dtype=jnp.float32) * 0.1
    inp2 = jax.random.randint(k_tok2, (B, S), 0, n_token, dtype=jnp.int32)
    out2 = jax.block_until_ready(adaptive_embedding(inp2, emb_table2, proj2))
    ref2 = jnp.dot(
        emb_table2[inp2], proj2.T, precision=jax.lax.Precision.HIGHEST
    ) * (d_proj2 ** 0.5)
    assert out2.shape == (B, S, d_proj2), out2.shape
    assert jnp.allclose(out2, ref2, atol=1e-4, rtol=1e-4), "mismatch (projection path)"

    print("KERNEL_OK")
</pallas_src>

<mosaic_0001>
module attributes {stable_mosaic.version = 11 : i64} {
  func.func @_gather_kernel(%arg0: i32, %arg1: memref<16x1xi32, #tpu.memory_space<vmem>>, %arg2: memref<128x512xf32, #tpu.memory_space<vmem>>, %arg3: memref<16x512xf32, #tpu.memory_space<vmem>>) attributes {dimension_semantics = [#tpu.dimension_semantics<parallel>], iteration_bounds = array<i64: 1>, scalar_prefetch = 0 : i64, scratch_operands = 0 : i64, tpu.core_type = #tpu.core_type<tc>, window_params = [{transform_indices = @transform_0, window_bounds = array<i64: 16, 1>}, {pipeline_mode = #tpu.pipeline_mode<synchronous>, transform_indices = @transform_1, window_bounds = array<i64: 128, 512>}, {transform_indices = @transform_2, window_bounds = array<i64: 16, 512>}]} {
    %c0 = arith.constant 0 : index
    %c0_0 = arith.constant 0 : index
    %0 = vector.load %arg1[%c0, %c0_0] : memref<16x1xi32, #tpu.memory_space<vmem>>, vector<16x1xi32>
    %1 = tpu.iota {dimensions = array<i32: 1>} : vector<16x128xi32>
    %2 = vector.broadcast %0 : vector<16x1xi32> to vector<16x128xi32>
    %3 = arith.cmpi eq, %1, %2 : vector<16x128xi32>
    %4 = arith.extui %3 : vector<16x128xi1> to vector<16x128xi32>
    %5 = arith.sitofp %4 : vector<16x128xi32> to vector<16x128xf32>
    %c0_1 = arith.constant 0 : index
    %c0_2 = arith.constant 0 : index
    %6 = vector.load %arg2[%c0_1, %c0_2] : memref<128x512xf32, #tpu.memory_space<vmem>>, vector<128x512xf32>
    %cst = arith.constant dense<0.000000e+00> : vector<16x512xf32>
    %7 = tpu.matmul %5, %6, %cst {dimension_numbers = #tpu.dot_dimension_numbers<[1], [0], [0], [1], [0, 0, 1, 1], [], []>, precision = #tpu.contract_precision<fp32>} : vector<16x128xf32>, vector<128x512xf32>, vector<16x512xf32> -> vector<16x512xf32>
    %c0_3 = arith.constant 0 : index
    %c0_4 = arith.constant 0 : index
    %8 = vector.load %arg3[%c0_3, %c0_4] : memref<16x512xf32, #tpu.memory_space<vmem>>, vector<16x512xf32>
    tpu.vector_store %arg3[%c0_3, %c0_4], %7 {strides = array<i32>} : memref<16x512xf32, #tpu.memory_space<vmem>>, vector<16x512xf32>,
    return
  }
  func.func @transform_0(%arg0: i32) -> (i32, i32) {
    %c0_i32 = arith.constant 0 : i32
    %c0_i32_0 = arith.constant 0 : i32
    return %arg0, %c0_i32 : i32, i32
  }
  func.func @transform_1(%arg0: i32) -> (i32, i32) {
    %c0_i32 = arith.constant 0 : i32
    %c0_i32_0 = arith.constant 0 : i32
    %c0_i32_1 = arith.constant 0 : i32
    return %c0_i32, %c0_i32_0 : i32, i32
  }
  func.func @transform_2(%arg0: i32) -> (i32, i32) {
    %c0_i32 = arith.constant 0 : i32
    %c0_i32_0 = arith.constant 0 : i32
    return %arg0, %c0_i32 : i32, i32
  }
}

</mosaic_0001>

<bundles_post_ra>
// kernel: tpu_custom_call.1
= control target key start
LH: loop header
LB: loop body
LE: loop exit
PB: predicated region body
PF: predicated region fallthrough
CT: control target
= control target key end

     0   :  { %7 = vsyncpa [#allocation3], 0  ;;  %s3605_s0 = inlined_call_operand.vmem [shape: s32[16,1], index: 0, kind: input, shape index: {}]   ;;  %s3606_s1 = inlined_call_operand.hbm [shape: f32[128,512], index: 1, kind: input, shape index: {}]   ;;  %s3607_s2 = inlined_call_operand.hbm [shape: f32[16,512], index: 2, kind: output, shape index: {}]  }
   0x1   :  { %8 = vsyncpa [#allocation4], 0  ;;  %s2433_s9 = smov [#allocation2]   ;;  %s2385_s13 = scalar_lea.hbm %s3606_s1, 8192 }
   0x2   :  { %s16_s10 = sshll.u32 %s2433_s9, 4  ;;  %p2386_p0 = scmp.ne.s32.totalorder %s3606_s1, %s2385_s13  ;;  %s17_s10 = int_to_ptr.vmem [resolvable:$true] %s16_s10 }
   0x3   :  { %p2389_p1 = scmp.lt.u32.totalorder %s2385_s13, %s3606_s1 }
   0x5   :  { %p2391_p2 = pnand %p2389_p1, %p2386_p0 }
   0x7   :  { %2394 = shalt.err (!%p2391_p2)
}
   0x8   :  { %s2395_s18 = scalar_lea.vmem %s17_s10, 8192  ;;  %p2400_p4 = scmp.lt.s32.totalorder %s17_s10, %s17_s10 }
   0x9   :  { %p2396_p3 = scmp.ne.s32.totalorder %s17_s10, %s2395_s18  ;;  %p2401_p5 = scmp.lt.s32.totalorder %s2395_s18, %s2395_s18 }
   0xb   :  { %p2402_p6 = por %p2401_p5, %p2400_p4 }
   0xd   :  { %p2403_p7 = pnand %p2402_p6, %p2396_p3 }
   0xf   :  { %2406 = shalt.err (!%p2403_p7)
}
  0x10   :  { %s2434_s19 = smov 512   ;;  %s2435_s20 = smov 32  }
  0x11   :  { %22 = dma.hbm_to_vmem [thread:$0]  %s3606_s1, 8192, %s17_s10, [#allocation3], %s2434_s19, %s2434_s19, %s2435_s20  }
  0x12   :  { %2429 = dma.done.wait [#allocation3], 8192  }
  0x13   :  { %2430 = vsyncadd [#allocation3], 4294959104  ;;  %v2436_v0 = vmov 0   ;;  %v26_v1 = vld [vmem:[%s3605_s0] sm:$0xff]  ;;  %v27_v2 = vld [vmem:[%s3605_s0 + $0x8] sm:$0xff]  ;;  %v3608_v14 = vmov 0.0  }
  0x14   :  { %2384 = vset.pattern.permute.xlu0 %v2436_v0  ;;  %v43_v3 = vld [vmem:[#allocation2 + $0x8] sm:$0xff]  ;;  %v45_v6 = vld [vmem:[#allocation2 + $0x18] sm:$0xff]  ;;  %v42_v11 = vld [vmem:[#allocation2] sm:$0xff]  ;;  %202 = vmatprep.mubr.f32.mxu0 %v3608_v14  ;;  %s2439_s0 = smov [#allocation5]  }
  0x15   :  { %31 = vperm.xlu0 %2384, %v26_v1   ;;  %v47_v4 = vld [vmem:[#allocation2 + $0x28] sm:$0xff]  ;;  %v106_v5 = vand.u32 4294901760, %v43_v3  ;;  %v49_v7 = vld [vmem:[#allocation2 + $0x38] sm:$0xff]  ;;  %v1010_v9 = vand.u32 4294901760, %v45_v6  ;;  %v46_v12 = vld [vmem:[#allocation2 + $0x20] sm:$0xff]  ;;  %1106 = vmatprep.mubr.f32.mxu1 %v3608_v14  ;;  %v108_v16 = vand.u32 4294901760, %v42_v11 }
  0x16   :  { %v110_v8 = vand.u32 4294901760, %v47_v4  ;;  %v1014_v10 = vand.u32 4294901760, %v49_v7  ;;  %v44_v13 = vld [vmem:[#allocation2 + $0x10] sm:$0xff]  ;;  %v112_v17 = vand.u32 4294901760, %v46_v12  ;;  %v51_v20 = vld [vmem:[#allocation2 + $0x48] sm:$0xff]  ;;  %v53_v26 = vld [vmem:[#allocation2 + $0x58] sm:$0xff] }
  0x17   :  { %v2478_v15 = vsub.f32 %v43_v3, %v106_v5  ;;  %v48_v18 = vld [vmem:[#allocation2 + $0x30] sm:$0xff]  ;;  %v1012_v19 = vand.u32 4294901760, %v44_v13  ;;  %v55_v21 = vld [vmem:[#allocation2 + $0x68] sm:$0xff]  ;;  %v2486_v25 = vsub.f32 %v45_v6, %v1010_v9  ;;  %v57_v27 = vld [vmem:[#allocation2 + $0x78] sm:$0xff]  ;;  %v2492_v31 = vsub.f32 %v42_v11, %v108_v16  ;;  %s1927_s1 = sshll.u32 %s2439_s0, 4  ;;  %s1928_s1 = int_to_ptr.vmem [resolvable:$true] %s1927_s1 }
  0x18   :  { %v2480_v22 = vpack.c.bf16 %v110_v8, %v106_v5  ;;  %v2482_v23 = vsub.f32 %v47_v4, %v110_v8  ;;  %v2484_v24 = vpack.c.bf16 %v1014_v10, %v1010_v9  ;;  %v50_v28 = vld [vmem:[#allocation2 + $0x40] sm:$0xff]  ;;  %v2488_v29 = vsub.f32 %v49_v7, %v1014_v10  ;;  %v52_v42 = vld [vmem:[#allocation2 + $0x50] sm:$0xff]  ;;  %v59_v48 = vld [vmem:[#allocation2 + $0x88] sm:$0xff]  ;;  %s2407_s27 = scalar_lea.vmem %s1928_s1, 1024  ;;  %p2412_p9 = scmp.lt.s32.totalorder %s1928_s1, %s1928_s1 }
  0x19   :  { %3810 = vst [vmem:[#allocation8_spill] sm:$0xff] %v2478_v15  ;;  %3813 = vst [vmem:[#allocation11_spill] sm:$0xff] %v2486_v25  ;;  %34 = vperm.xlu0 %2384, %v27_v2   ;;  %v2490_v30 = vpack.c.bf16 %v112_v17, %v108_v16  ;;  %v2494_v32 = vsub.f32 %v46_v12, %v112_v17  ;;  %v54_v33 = vld [vmem:[#allocation2 + $0x60] sm:$0xff]  ;;  %v1016_v34 = vand.u32 4294901760, %v48_v18  ;;  %v114_v36 = vand.u32 4294901760, %v51_v20  ;;  %v56_v43 = vld [vmem:[#allocation2 + $0x70] sm:$0xff]  ;;  %p2408_p8 = scmp.ne.s32.totalorder %s1928_s1, %s2407_s27  ;;  %p2413_p10 = scmp.lt.s32.totalorder %s2407_s27, %s2407_s27 }
  0x1a   :  { %3811 = vst [vmem:[#allocation9_spill] sm:$0xff] %v2480_v22  ;;  %3812 = vst [vmem:[#allocation10_spill] sm:$0xff] %v2484_v24  ;;  %1954 = vmatprep.subr.bf16.mxu0 %v2480_v22  ;;  %2146 = vmatprep.subr.bf16.mxu1 %v2484_v24  ;;  %v2498_v35 = vsub.f32 %v44_v13, %v1012_v19  ;;  %v118_v37 = vand.u32 4294901760, %v55_v21  ;;  %v1018_v38 = vand.u32 4294901760, %v53_v26  ;;  %v1022_v39 = vand.u32 4294901760, %v57_v27  ;;  %v63_v49 = vld [vmem:[#allocation2 + $0xa8] sm:$0xff] }
  0x1b   :  { %3814 = vst [vmem:[#allocation12_spill] sm:$0xff] %v2488_v29  ;;  %3815 = vst [vmem:[#allocation13_spill] sm:$0xff] %v2490_v30  ;;  %1956 = vmatpush1.bf16.msra.mxu0 %v2490_v30  ;;  %v116_v40 = vand.u32 4294901760, %v50_v28  ;;  %v120_v41 = vand.u32 4294901760, %v54_v33  ;;  %v2501_v44 = vpack.c.bf16 %v1016_v34, %v1012_v19  ;;  %v2503_v45 = vsub.f32 %v48_v18, %v1016_v34  ;;  %v61_v50 = vld [vmem:[#allocation2 + $0x98] sm:$0xff]  ;;  %v58_v56 = vld [vmem:[#allocation2 + $0x80] sm:$0xff]  ;;  %p2414_p11 = por %p2413_p10, %p2412_p9 }
  0x1c   :  { %3816 = vst [vmem:[#allocation14_spill] sm:$0xff] %v2494_v32  ;;  %v2505_v46 = vpack.c.bf16 %v118_v37, %v114_v36  ;;  %v2507_v47 = vsub.f32 %v51_v20, %v114_v36  ;;  %v2509_v51 = vsub.f32 %v55_v21, %v118_v37  ;;  %v2511_v52 = vpack.c.bf16 %v1022_v39, %v1018_v38  ;;  %v65_v55 = vld [vmem:[#allocation2 + $0xb8] sm:$0xff]  ;;  %v62_v57 = vld [vmem:[#allocation2 + $0xa0] sm:$0xff]  ;;  %v60_v6 = vld [vmem:[#allocation2 + $0x90] sm:$0xff] }
  0x1d   :  { %3817 = vst [vmem:[#allocation15_spill] sm:$0xff] %v2501_v44  ;;  %v2513_v53 = vsub.f32 %v53_v26, %v1018_v38  ;;  %v2515_v54 = vsub.f32 %v57_v27, %v1022_v39  ;;  %2148 = vmatpush1.bf16.msra.mxu1 %v2501_v44  ;;  %v2519_v58 = vpack.c.bf16 %v120_v41, %v116_v40  ;;  %v1020_v61 = vand.u32 4294901760, %v52_v42  ;;  %v64_v7 = vld [vmem:[#allocation2 + $0xb0] sm:$0xff]  ;;  %v67_v12 = vld [vmem:[#allocation2 + $0xc8] sm:$0xff]  ;;  %v69_v16 = vld [vmem:[#allocation2 + $0xd8] sm:$0xff]  ;;  %p2415_p12 = pnand %p2414_p11, %p2408_p8 }
  0x1e   :  { %3818 = vst [vmem:[#allocation16_spill] sm:$0xff] %v2505_v46  ;;  %3819 = vst [vmem:[#allocation17_spill] sm:$0xff] %v2511_v52  ;;  %1958 = vmatprep.subr.bf16.mxu0 %v2505_v46  ;;  %v2521_v59 = vsub.f32 %v50_v28, %v116_v40  ;;  %v2523_v60 = vsub.f32 %v54_v33, %v120_v41  ;;  %2150 = vmatprep.subr.bf16.mxu1 %v2511_v52  ;;  %v1024_v62 = vand.u32 4294901760, %v56_v43  ;;  %v71_v13 = vld [vmem:[#allocation2 + $0xe8] sm:$0xff]  ;;  %v73_v21 = vld [vmem:[#allocation2 + $0xf8] sm:$0xff] }
  0x1f   :  { %3820 = vst [vmem:[#allocation18_spill] sm:$0xff] %v2519_v58  ;;  %v122_v63 = vand.u32 4294901760, %v59_v48  ;;  %v126_v0 = vand.u32 4294901760, %v63_v49  ;;  %v1026_v1 = vand.u32 4294901760, %v61_v50  ;;  %1960 = vmatpush1.bf16.msra.mxu0 %v2519_v58  ;;  %v2527_v2 = vsub.f32 %v52_v42, %v1020_v61  ;;  %v66_v26 = vld [vmem:[#allocation2 + $0xc0] sm:$0xff]  ;;  %v89_v46 = vld [vmem:[#allocation2 + $0x178] sm:$0xff] }
  0x20   :  { %v1030_v3 = vand.u32 4294901760, %v65_v55  ;;  %v124_v4 = vand.u32 4294901760, %v58_v56  ;;  %v128_v5 = vand.u32 4294901760, %v62_v57  ;;  %v2529_v8 = vpack.c.bf16 %v1024_v62, %v1020_v61  ;;  %v70_v27 = vld [vmem:[#allocation2 + $0xe0] sm:$0xff]  ;;  %v84_v30 = vld [vmem:[#allocation2 + $0x150] sm:$0xff]  ;;  %v95_v22 = vld [vmem:[#allocation2 + $0x1a8] sm:$0xff] }
  0x21   :  { %v2531_v9 = vsub.f32 %v56_v43, %v1024_v62  ;;  %v2533_v10 = vpack.c.bf16 %v126_v0, %v122_v63  ;;  %v2535_v11 = vsub.f32 %v59_v48, %v122_v63  ;;  %v2537_v17 = vsub.f32 %v63_v49, %v126_v0  ;;  %v68_v49 = vld [vmem:[#allocation2 + $0xd0] sm:$0xff]  ;;  %v75_v62 = vld [vmem:[#allocation2 + $0x108] sm:$0xff]  ;;  %v77_v0 = vld [vmem:[#allocation2 + $0x118] sm:$0xff] }
  0x22   :  { %3821 = vst [vmem:[#allocation19_spill] sm:$0xff] %v2529_v8  ;;  %v2539_v18 = vpack.c.bf16 %v1030_v3, %v1026_v1  ;;  %v2541_v19 = vsub.f32 %v61_v50, %v1026_v1  ;;  %v2543_v20 = vsub.f32 %v65_v55, %v1030_v3  ;;  %2152 = vmatpush1.bf16.msra.mxu1 %v2529_v8  ;;  %v1028_v36 = vand.u32 4294901760, %v60_v6  ;;  %v72_v50 = vld [vmem:[#allocation2 + $0xf0] sm:$0xff]  ;;  %v79_v63 = vld [vmem:[#allocation2 + $0x128] sm:$0xff]  ;;  %v78_v14 = vld [vmem:[#allocation2 + $0x120] sm:$0xff] }
  0x23   :  { %3822 = vst [vmem:[#allocation20_spill] sm:$0xff] %v2533_v10  ;;  %1962 = vmatprep.subr.bf16.mxu0 %v2533_v10  ;;  %v2547_v28 = vpack.c.bf16 %v128_v5, %v124_v4  ;;  %v2549_v33 = vsub.f32 %v58_v56, %v124_v4  ;;  %v2551_v34 = vsub.f32 %v62_v57, %v128_v5  ;;  %v1032_v37 = vand.u32 4294901760, %v64_v7  ;;  %v87_v10 = vld [vmem:[#allocation2 + $0x168] sm:$0xff]  ;;  %v85_v8 = vld [vmem:[#allocation2 + $0x158] sm:$0xff]  ;;  %v86_v44 = vld [vmem:[#allocation2 + $0x160] sm:$0xff] }
  0x24   :  { %3823 = vst [vmem:[#allocation21_spill] sm:$0xff] %v2539_v18  ;;  %3824 = vst [vmem:[#allocation22_spill] sm:$0xff] %v2541_v19  ;;  %2154 = vmatprep.subr.bf16.mxu1 %v2539_v18  ;;  %v130_v38 = vand.u32 4294901760, %v67_v12  ;;  %v134_v39 = vand.u32 4294901760, %v71_v13  ;;  %v1034_v40 = vand.u32 4294901760, %v69_v16  ;;  %v2555_v41 = vsub.f32 %v60_v6, %v1028_v36  ;;  %v81_v6 = vld [vmem:[#allocation2 + $0x138] sm:$0xff] }
  0x25   :  { %3825 = vst [vmem:[#allocation23_spill] sm:$0xff] %v2547_v28  ;;  %3826 = vst [vmem:[#allocation24_spill] sm:$0xff] %v2549_v33  ;;  %1964 = vmatpush1.bf16.msra.mxu0 %v2547_v28  ;;  %v1038_v42 = vand.u32 4294901760, %v73_v21  ;;  %v132_v43 = vand.u32 4294901760, %v66_v26  ;;  %v136_v48 = vand.u32 4294901760, %v70_v27  ;;  %v2557_v55 = vpack.c.bf16 %v1032_v37, %v1028_v36  ;;  %v74_v36 = vld [vmem:[#allocation2 + $0x100] sm:$0xff] }
  0x26   :  { %3827 = vst [vmem:[#allocation25_spill] sm:$0xff] %v2555_v41  ;;  %v2559_v56 = vsub.f32 %v64_v7, %v1032_v37  ;;  %v2561_v57 = vpack.c.bf16 %v134_v39, %v130_v38  ;;  %v2563_v61 = vsub.f32 %v67_v12, %v130_v38  ;;  %v2565_v1 = vsub.f32 %v71_v13, %v134_v39  ;;  %v76_v28 = vld [vmem:[#allocation2 + $0x110] sm:$0xff] }
  0x27   :  { %3828 = vst [vmem:[#allocation26_spill] sm:$0xff] %v2557_v55  ;;  %v2567_v3 = vpack.c.bf16 %v1038_v42, %v1034_v40  ;;  %v2569_v4 = vsub.f32 %v69_v16, %v1034_v40  ;;  %v2571_v5 = vsub.f32 %v73_v21, %v1038_v42  ;;  %2156 = vmatpush1.bf16.msra.mxu1 %v2557_v55  ;;  %v1036_v13 = vand.u32 4294901760, %v68_v49  ;;  %v80_v18 = vld [vmem:[#allocation2 + $0x130] sm:$0xff] }
  0x28   :  { %3829 = vst [vmem:[#allocation27_spill] sm:$0xff] %v2561_v57  ;;  %3830 = vst [vmem:[#allocation28_spill] sm:$0xff] %v2565_v1  ;;  %1966 = vmatprep.subr.bf16.mxu0 %v2561_v57  ;;  %v2575_v7 = vpack.c.bf16 %v136_v48, %v132_v43  ;;  %v2577_v12 = vsub.f32 %v66_v26, %v132_v43  ;;  %v2579_v37 = vsub.f32 %v70_v27, %v136_v48  ;;  %v88_v24 = vld [vmem:[#allocation2 + $0x170] sm:$0xff] }
  0x29   :  { %3831 = vst [vmem:[#allocation29_spill] sm:$0xff] %v2567_v3  ;;  %3832 = vst [vmem:[#allocation30_spill] sm:$0xff] %v2569_v4  ;;  %2158 = vmatprep.subr.bf16.mxu1 %v2567_v3  ;;  %v1040_v16 = vand.u32 4294901760, %v72_v50  ;;  %v138_v38 = vand.u32 4294901760, %v75_v62  ;;  %v142_v21 = vand.u32 4294901760, %v79_v63  ;;  %v1042_v39 = vand.u32 4294901760, %v77_v0 }
  0x2a   :  { %3833 = vst [vmem:[#allocation31_spill] sm:$0xff] %v2571_v5  ;;  %3834 = vst [vmem:[#allocation32_spill] sm:$0xff] %v2575_v7  ;;  %1968 = vmatpush1.bf16.msra.mxu0 %v2575_v7  ;;  %v2583_v40 = vsub.f32 %v68_v49, %v1036_v13  ;;  %v1046_v42 = vand.u32 4294901760, %v81_v6  ;;  %v140_v55 = vand.u32 4294901760, %v74_v36  ;;  %v144_v57 = vand.u32 4294901760, %v78_v14  ;;  %v83_v3 = vld [vmem:[#allocation2 + $0x148] sm:$0xff] }
  0x2b   :  { %3835 = vst [vmem:[#allocation33_spill] sm:$0xff] %v2577_v12  ;;  %3836 = vst [vmem:[#allocation34_spill] sm:$0xff] %v2579_v37  ;;  %v2585_v26 = vpack.c.bf16 %v1040_v16, %v1036_v13  ;;  %v2587_v27 = vsub.f32 %v72_v50, %v1040_v16  ;;  %v2589_v43 = vpack.c.bf16 %v142_v21, %v138_v38  ;;  %v82_v13 = vld [vmem:[#allocation2 + $0x140] sm:$0xff] }
  0x2c   :  { %3837 = vst [vmem:[#allocation35_spill] sm:$0xff] %v2583_v40  ;;  %v2591_v48 = vsub.f32 %v75_v62, %v138_v38  ;;  %v2593_v58 = vsub.f32 %v79_v63, %v142_v21  ;;  %v2595_v49 = vpack.c.bf16 %v1046_v42, %v1042_v39  ;;  %v2597_v7 = vsub.f32 %v77_v0, %v1042_v39 }
  0x2d   :  { %3838 = vst [vmem:[#allocation36_spill] sm:$0xff] %v2585_v26  ;;  %3839 = vst [vmem:[#allocation37_spill] sm:$0xff] %v2587_v27  ;;  %v2599_v52 = vsub.f32 %v81_v6, %v1046_v42  ;;  %2160 = vmatpush1.bf16.msra.mxu1 %v2585_v26  ;;  %1970 = vmatprep.subr.bf16.mxu0 %v2589_v43  ;;  %v2603_v50 = vpack.c.bf16 %v144_v57, %v140_v55  ;;  %v1044_v63 = vand.u32 4294901760, %v76_v28 }
  0x2e   :  { %3840 = vst [vmem:[#allocation38_spill] sm:$0xff] %v2589_v43  ;;  %3841 = vst [vmem:[#allocation39_spill] sm:$0xff] %v2591_v48  ;;  %v2605_v62 = vsub.f32 %v74_v36, %v140_v55  ;;  %v2607_v16 = vsub.f32 %v78_v14, %v144_v57  ;;  %2162 = vmatprep.subr.bf16.mxu1 %v2595_v49  ;;  %v1048_v0 = vand.u32 4294901760, %v80_v18  ;;  %v146_v38 = vand.u32 4294901760, %v83_v3 }
  0x2f   :  { %3842 = vst [vmem:[#allocation40_spill] sm:$0xff] %v2593_v58  ;;  %3843 = vst [vmem:[#allocation41_spill] sm:$0xff] %v2595_v49  ;;  %v150_v6 = vand.u32 4294901760, %v87_v10  ;;  %v1050_v21 = vand.u32 4294901760, %v85_v8  ;;  %1972 = vmatpush1.bf16.msra.mxu0 %v2603_v50  ;;  %v2611_v39 = vsub.f32 %v76_v28, %v1044_v63  ;;  %v1054_v42 = vand.u32 4294901760, %v89_v46  ;;  %v91_v49 = vld [vmem:[#allocation2 + $0x188] sm:$0xff] }
  0x30   :  { %3844 = vst [vmem:[#allocation42_spill] sm:$0xff] %v2597_v7  ;;  %3845 = vst [vmem:[#allocation43_spill] sm:$0xff] %v2599_v52  ;;  %v148_v26 = vand.u32 4294901760, %v82_v13  ;;  %v152_v43 = vand.u32 4294901760, %v86_v44  ;;  %v2613_v55 = vpack.c.bf16 %v1048_v0, %v1044_v63  ;;  %v2615_v14 = vsub.f32 %v80_v18, %v1048_v0  ;;  %v97_v52 = vld [vmem:[#allocation2 + $0x1b8] sm:$0xff]  ;;  %v90_v63 = vld [vmem:[#allocation2 + $0x180] sm:$0xff] }
  0x31   :  { %3846 = vst [vmem:[#allocation44_spill] sm:$0xff] %v2603_v50  ;;  %3847 = vst [vmem:[#allocation45_spill] sm:$0xff] %v2605_v62  ;;  %v2617_v57 = vpack.c.bf16 %v150_v6, %v146_v38  ;;  %v2619_v36 = vsub.f32 %v83_v3, %v146_v38  ;;  %v2621_v62 = vsub.f32 %v87_v10, %v150_v6  ;;  %v94_v7 = vld [vmem:[#allocation2 + $0x1a0] sm:$0xff]  ;;  %v1052_v10 = vand.u32 4294901760, %v84_v30 }
  0x32   :  { %3848 = vst [vmem:[#allocation46_spill] sm:$0xff] %v2607_v16  ;;  %3849 = vst [vmem:[#allocation47_spill] sm:$0xff] %v2611_v39  ;;  %v93_v16 = vld [vmem:[#allocation2 + $0x198] sm:$0xff]  ;;  %v2623_v28 = vpack.c.bf16 %v1054_v42, %v1050_v21  ;;  %v2625_v50 = vsub.f32 %v85_v8, %v1050_v21  ;;  %v2627_v39 = vsub.f32 %v89_v46, %v1054_v42  ;;  %2164 = vmatpush1.bf16.msra.mxu1 %v2613_v55 }
  0x33   :  { %3850 = vst [vmem:[#allocation48_spill] sm:$0xff] %v2613_v55  ;;  %3851 = vst [vmem:[#allocation49_spill] sm:$0xff] %v2615_v14  ;;  %1974 = vmatprep.subr.bf16.mxu0 %v2617_v57  ;;  %v2631_v18 = vpack.c.bf16 %v152_v43, %v148_v26  ;;  %v2633_v3 = vsub.f32 %v82_v13, %v148_v26  ;;  %v2635_v0 = vsub.f32 %v86_v44, %v152_v43  ;;  %v102_v14 = vld [vmem:[#allocation2 + $0x1e0] sm:$0xff] }
  0x34   :  { %3852 = vst [vmem:[#allocation50_spill] sm:$0xff] %v2617_v57  ;;  %3853 = vst [vmem:[#allocation51_spill] sm:$0xff] %v2619_v36  ;;  %2166 = vmatprep.subr.bf16.mxu1 %v2623_v28  ;;  %v1056_v8 = vand.u32 4294901760, %v88_v24  ;;  %v154_v38 = vand.u32 4294901760, %v91_v49  ;;  %v158_v46 = vand.u32 4294901760, %v95_v22  ;;  %v1058_v6 = vand.u32 4294901760, %v93_v16 }
  0x35   :  { %3854 = vst [vmem:[#allocation52_spill] sm:$0xff] %v2621_v62  ;;  %3855 = vst [vmem:[#allocation53_spill] sm:$0xff] %v2623_v28  ;;  %1976 = vmatpush1.bf16.msra.mxu0 %v2631_v18  ;;  %v2639_v21 = vsub.f32 %v84_v30, %v1052_v10  ;;  %v1062_v42 = vand.u32 4294901760, %v97_v52  ;;  %v156_v55 = vand.u32 4294901760, %v90_v63  ;;  %v160_v57 = vand.u32 4294901760, %v94_v7  ;;  %v99_v28 = vld [vmem:[#allocation2 + $0x1c8] sm:$0xff] }
  0x36   :  { %3856 = vst [vmem:[#allocation54_spill] sm:$0xff] %v2625_v50  ;;  %3857 = vst [vmem:[#allocation55_spill] sm:$0xff] %v2627_v39  ;;  %v92_v39 = vld [vmem:[#allocation2 + $0x190] sm:$0xff]  ;;  %v2641_v26 = vpack.c.bf16 %v1056_v8, %v1052_v10  ;;  %v2643_v44 = vsub.f32 %v88_v24, %v1056_v8  ;;  %v2645_v43 = vpack.c.bf16 %v158_v46, %v154_v38  ;;  %v105_v36 = vld [vmem:[#allocation2 + $0x1f8] sm:$0xff] }
  0x37   :  { %3858 = vst [vmem:[#allocation56_spill] sm:$0xff] %v2631_v18  ;;  %3859 = vst [vmem:[#allocation57_spill] sm:$0xff] %v2633_v3  ;;  %v96_v50 = vld [vmem:[#allocation2 + $0x1b0] sm:$0xff]  ;;  %v2647_v13 = vsub.f32 %v91_v49, %v154_v38  ;;  %v101_v3 = vld [vmem:[#allocation2 + $0x1d8] sm:$0xff]  ;;  %v2649_v62 = vsub.f32 %v95_v22, %v158_v46  ;;  %v2651_v30 = vpack.c.bf16 %v1062_v42, %v1058_v6  ;;  %v1060_v22 = vand.u32 4294901760, %v92_v39 }
  0x38   :  { %3860 = vst [vmem:[#allocation58_spill] sm:$0xff] %v2635_v0  ;;  %3861 = vst [vmem:[#allocation59_spill] sm:$0xff] %v2639_v21  ;;  %v103_v0 = vld [vmem:[#allocation2 + $0x1e8] sm:$0xff]  ;;  %v2653_v18 = vsub.f32 %v93_v16, %v1058_v6  ;;  %v2655_v21 = vsub.f32 %v97_v52, %v1062_v42  ;;  %v98_v10 = vld [vmem:[#allocation2 + $0x1c0] sm:$0xff]  ;;  %2168 = vmatpush1.bf16.msra.mxu1 %v2641_v26  ;;  %1978 = vmatprep.subr.bf16.mxu0 %v2645_v43  ;;  %v1064_v16 = vand.u32 4294901760, %v96_v50 }
  0x39   :  { %3862 = vst [vmem:[#allocation60_spill] sm:$0xff] %v2641_v26  ;;  %3863 = vst [vmem:[#allocation61_spill] sm:$0xff] %v2643_v44  ;;  %v2659_v24 = vpack.c.bf16 %v160_v57, %v156_v55  ;;  %v2661_v49 = vsub.f32 %v90_v63, %v156_v55  ;;  %v2663_v8 = vsub.f32 %v94_v7, %v160_v57  ;;  %2170 = vmatprep.subr.bf16.mxu1 %v2651_v30  ;;  %v104_v63 = vld [vmem:[#allocation2 + $0x1f0] sm:$0xff] }
  0x3a   :  { %3864 = vst [vmem:[#allocation62_spill] sm:$0xff] %v2645_v43  ;;  %3865 = vst [vmem:[#allocation63_spill] sm:$0xff] %v2647_v13  ;;  %v162_v38 = vand.u32 4294901760, %v99_v28  ;;  %v166_v52 = vand.u32 4294901760, %v103_v0  ;;  %v1066_v46 = vand.u32 4294901760, %v101_v3  ;;  %v2667_v6 = vsub.f32 %v92_v39, %v1060_v22 }
  0x3b   :  { %3866 = vst [vmem:[#allocation64_spill] sm:$0xff] %v2651_v30  ;;  %3867 = vst [vmem:[#allocation65_spill] sm:$0xff] %v2653_v18  ;;  %1980 = vmatpush1.bf16.msra.mxu0 %v2659_v24  ;;  %v1070_v42 = vand.u32 4294901760, %v105_v36  ;;  %v164_v26 = vand.u32 4294901760, %v98_v10  ;;  %v168_v43 = vand.u32 4294901760, %v102_v14  ;;  %v2669_v18 = vpack.c.bf16 %v1064_v16, %v1060_v22 }
  0x3c   :  { %3868 = vst [vmem:[#allocation66_spill] sm:$0xff] %v2655_v21  ;;  %3869 = vst [vmem:[#allocation67_spill] sm:$0xff] %v2659_v24  ;;  %v100_v21 = vld [vmem:[#allocation2 + $0x1d0] sm:$0xff]  ;;  %v2671_v55 = vsub.f32 %v96_v50, %v1064_v16  ;;  %v2673_v7 = vpack.c.bf16 %v166_v52, %v162_v38  ;;  %v2675_v57 = vsub.f32 %v99_v28, %v162_v38  ;;  %v3680_v38 = vand.u32 4294901760, %v2478_v15 }
  0x3d   :  { %3870 = vst [vmem:[#allocation68_spill] sm:$0xff] %v2661_v49  ;;  %3871 = vst [vmem:[#allocation69_spill] sm:$0xff] %v2663_v8  ;;  %v2677_v30 = vsub.f32 %v103_v0, %v166_v52  ;;  %v2679_v8 = vpack.c.bf16 %v1070_v42, %v1066_v46  ;;  %v2681_v24 = vsub.f32 %v101_v3, %v1066_v46  ;;  %2172 = vmatpush1.bf16.msra.mxu1 %v2669_v18 }
  0x3e   :  { %3872 = vst [vmem:[#allocation70_spill] sm:$0xff] %v2669_v18  ;;  %3873 = vst [vmem:[#allocation71_spill] sm:$0xff] %v2671_v55  ;;  %v2683_v39 = vsub.f32 %v105_v36, %v1070_v42  ;;  %1982 = vmatprep.subr.bf16.mxu0 %v2673_v7  ;;  %v2687_v22 = vpack.c.bf16 %v168_v43, %v164_v26  ;;  %v2689_v50 = vsub.f32 %v98_v10, %v164_v26 }
  0x3f   :  { %3874 = vst [vmem:[#allocation72_spill] sm:$0xff] %v2673_v7  ;;  %3875 = vst [vmem:[#allocation73_spill] sm:$0xff] %v2675_v57  ;;  %v2691_v16 = vsub.f32 %v102_v14, %v168_v43  ;;  %v1068_v28 = vand.u32 4294901760, %v100_v21  ;;  %2174 = vmatprep.subr.bf16.mxu1 %v2679_v8  ;;  %v1072_v0 = vand.u32 4294901760, %v104_v63  ;;  %v3683_v3 = vand.u32 4294901760, %v2482_v23 }
  0x40   :  { %3876 = vst [vmem:[#allocation74_spill] sm:$0xff] %v2677_v30  ;;  %3877 = vst [vmem:[#allocation75_spill] sm:$0xff] %v2679_v8  ;;  %1984 = vmatpush1.bf16.msra.mxu0 %v2687_v22  ;;  %v228_v42 = vsub.f32 %v2478_v15, %v3680_v38  ;;  %v3885_v26 = vand.u32 4294901760, %v2488_v29  ;;  %v3703_v8 = vand.u32 4294901760, %v2498_v35 }
  0x41   :  { %3878 = vst [vmem:[#allocation76_spill] sm:$0xff] %v2683_v39  ;;  %3879 = vst [vmem:[#allocation77_spill] sm:$0xff] %v2687_v22  ;;  %v2698_v52 = vsub.f32 %v100_v21, %v1068_v28  ;;  %v2703_v43 = vpack.c.bf16 %v1072_v0, %v1068_v28  ;;  %v2705_v10 = vsub.f32 %v104_v63, %v1072_v0  ;;  %v3884_v21 = vand.u32 4294901760, %v2486_v25 }
  0x42   :  { %3880 = vst [vmem:[#allocation78_spill] sm:$0xff] %v2689_v50  ;;  %3881 = vst [vmem:[#allocation79_spill] sm:$0xff] %v2691_v16  ;;  %v240_v36 = vsub.f32 %v2482_v23, %v3683_v3  ;;  %v1144_v14 = vsub.f32 %v2488_v29, %v3885_v26  ;;  %v3886_v28 = vand.u32 4294901760, %v2492_v31  ;;  %v3887_v0 = vand.u32 4294901760, %v2494_v32 }
  0x43   :  { %3882 = vst [vmem:[#allocation80_spill] sm:$0xff] %v2703_v43  ;;  %3883 = vst [vmem:[#allocation81_spill] sm:$0xff] %v2705_v10  ;;  %v1132_v46 = vsub.f32 %v2486_v25, %v3884_v21  ;;  %2176 = vmatpush1.bf16.msra.mxu1 %v2703_v43  ;;  %v229_v22 = vand.u32 4294901760, %v228_v42  ;;  %v3701_v21 = vand.u32 4294901760, %v2503_v45  ;;  %v3698_v42 = vand.u32 4294901760, %v2507_v47 }
  0x44   :  { %v234_v63 = vsub.f32 %v2492_v31, %v3886_v28  ;;  %v246_v38 = vsub.f32 %v2494_v32, %v3887_v0  ;;  %v241_v3 = vand.u32 4294901760, %v240_v36  ;;  %v1145_v18 = vand.u32 4294901760, %v1144_v14 }
  0x45   :  { %v1133_v7 = vand.u32 4294901760, %v1132_v46  ;;  %v1138_v28 = vsub.f32 %v2498_v35, %v3703_v8  ;;  %v1150_v0 = vsub.f32 %v2503_v45, %v3701_v21  ;;  %v3699_v32 = vand.u32 4294901760, %v2509_v51 }
  0x46   :  { %v235_v25 = vand.u32 4294901760, %v234_v63  ;;  %v247_v26 = vand.u32 4294901760, %v246_v38  ;;  %v1985_v29 = vpack.c.bf16 %v241_v3, %v229_v22  ;;  %v3700_v46 = vand.u32 4294901760, %v2513_v53 }
  0x47   :  { %v2177_v36 = vpack.c.bf16 %v1145_v18, %v1133_v7  ;;  %v1139_v38 = vand.u32 4294901760, %v1138_v28  ;;  %v1151_v22 = vand.u32 4294901760, %v1150_v0  ;;  %v252_v3 = vsub.f32 %v2507_v47, %v3698_v42 }
  0x48   :  { %v2735_v43 = vpack.c.bf16 %v247_v26, %v235_v25  ;;  %1986 = vmatprep.subr.bf16.mxu0 %v1985_v29  ;;  %v3702_v14 = vand.u32 4294901760, %v2515_v54  ;;  %v264_v18 = vsub.f32 %v2509_v51, %v3699_v32  ;;  %v1156_v25 = vsub.f32 %v2513_v53, %v3700_v46 }
  0x49   :  { %2178 = vmatprep.subr.bf16.mxu1 %v2177_v36  ;;  %v3704_v7 = vand.u32 4294901760, %v2521_v59  ;;  %v3706_v29 = vand.u32 4294901760, %v2523_v60  ;;  %v2751_v63 = vpack.c.bf16 %v1151_v22, %v1139_v38  ;;  %v253_v26 = vand.u32 4294901760, %v252_v3 }
  0x4a   :  { %3888 = vst [vmem:[#allocation82_spill] sm:$0xff] %v2735_v43  ;;  %v1168_v28 = vsub.f32 %v2515_v54, %v3702_v14  ;;  %v3705_v0 = vand.u32 4294901760, %v2527_v2  ;;  %v265_v36 = vand.u32 4294901760, %v264_v18  ;;  %v1157_v42 = vand.u32 4294901760, %v1156_v25  ;;  %v3904_v43 = vld [vmem:[#allocation46_spill] sm:$0xff] }
  0x4b   :  { %3889 = vst [vmem:[#allocation83_spill] sm:$0xff] %v2751_v63  ;;  %v258_v32 = vsub.f32 %v2521_v59, %v3704_v7  ;;  %v270_v46 = vsub.f32 %v2523_v60, %v3706_v29  ;;  %v3707_v22 = vand.u32 4294901760, %v2531_v9  ;;  %v3709_v3 = vand.u32 4294901760, %v2535_v11 }
  0x4c   :  { %v1169_v21 = vand.u32 4294901760, %v1168_v28  ;;  %v1162_v38 = vsub.f32 %v2527_v2, %v3705_v0  ;;  %v2768_v14 = vpack.c.bf16 %v265_v36, %v253_v26  ;;  %v3708_v8 = vand.u32 4294901760, %v2537_v17 }
  0x4d   :  { %v259_v18 = vand.u32 4294901760, %v258_v32  ;;  %v271_v25 = vand.u32 4294901760, %v270_v46  ;;  %v1174_v28 = vsub.f32 %v2531_v9, %v3707_v22  ;;  %v276_v0 = vsub.f32 %v2535_v11, %v3709_v3 }
  0x4e   :  { %3890 = vst [vmem:[#allocation84_spill] sm:$0xff] %v2768_v14  ;;  %v2771_v7 = vpack.c.bf16 %v1169_v21, %v1157_v42  ;;  %v1163_v63 = vand.u32 4294901760, %v1162_v38  ;;  %v288_v32 = vsub.f32 %v2537_v17, %v3708_v8  ;;  %v3710_v46 = vand.u32 4294901760, %v2541_v19 }
  0x4f   :  { %v2779_v29 = vpack.c.bf16 %v271_v25, %v259_v18  ;;  %v3711_v21 = vand.u32 4294901760, %v2543_v20  ;;  %v1175_v42 = vand.u32 4294901760, %v1174_v28  ;;  %v277_v26 = vand.u32 4294901760, %v276_v0 }
  0x50   :  { %3891 = vst [vmem:[#allocation85_spill] sm:$0xff] %v2771_v7  ;;  %v3712_v36 = vand.u32 4294901760, %v2549_v33  ;;  %v3713_v38 = vand.u32 4294901760, %v2551_v34  ;;  %v289_v22 = vand.u32 4294901760, %v288_v32  ;;  %v1180_v18 = vsub.f32 %v2541_v19, %v3710_v46 }
  0x51   :  { %3892 = vst [vmem:[#allocation86_spill] sm:$0xff] %v2779_v29  ;;  %v1192_v25 = vsub.f32 %v2543_v20, %v3711_v21  ;;  %v3716_v8 = vand.u32 4294901760, %v2555_v41  ;;  %v2795_v3 = vpack.c.bf16 %v1175_v42, %v1163_v63  ;;  %v3714_v32 = vand.u32 4294901760, %v2559_v56 }
  0x52   :  { %v282_v0 = vsub.f32 %v2549_v33, %v3712_v36  ;;  %v294_v28 = vsub.f32 %v2551_v34, %v3713_v38  ;;  %v2804_v29 = vpack.c.bf16 %v289_v22, %v277_v26  ;;  %v1181_v46 = vand.u32 4294901760, %v1180_v18 }
  0x53   :  { %3893 = vst [vmem:[#allocation87_spill] sm:$0xff] %v2795_v3  ;;  %v1193_v7 = vand.u32 4294901760, %v1192_v25  ;;  %v1186_v21 = vsub.f32 %v2555_v41, %v3716_v8  ;;  %v1198_v36 = vsub.f32 %v2559_v56, %v3714_v32  ;;  %v3715_v3 = vand.u32 4294901760, %v2563_v61 }
  0x54   :  { %3894 = vst [vmem:[#allocation88_spill] sm:$0xff] %v2804_v29  ;;  %v283_v63 = vand.u32 4294901760, %v282_v0  ;;  %v295_v42 = vand.u32 4294901760, %v294_v28  ;;  %v3717_v22 = vand.u32 4294901760, %v2565_v1  ;;  %v3718_v26 = vand.u32 4294901760, %v2569_v4 }
  0x55   :  { %v2813_v14 = vpack.c.bf16 %v1193_v7, %v1181_v46  ;;  %v1187_v38 = vand.u32 4294901760, %v1186_v21  ;;  %v1199_v25 = vand.u32 4294901760, %v1198_v36  ;;  %v300_v0 = vsub.f32 %v2563_v61, %v3715_v3 }
  0x56   :  { %v2817_v18 = vpack.c.bf16 %v295_v42, %v283_v63  ;;  %v3719_v28 = vand.u32 4294901760, %v2571_v5  ;;  %v312_v32 = vsub.f32 %v2565_v1, %v3717_v22  ;;  %v1204_v7 = vsub.f32 %v2569_v4, %v3718_v26  ;;  %v3946_v1 = vld [vmem:[#allocation51_spill] sm:$0xff] }
  0x57   :  { %3895 = vst [vmem:[#allocation89_spill] sm:$0xff] %v2813_v14  ;;  %v3720_v46 = vand.u32 4294901760, %v2577_v12  ;;  %v3722_v21 = vand.u32 4294901760, %v2579_v37  ;;  %v2831_v63 = vpack.c.bf16 %v1199_v25, %v1187_v38  ;;  %v301_v36 = vand.u32 4294901760, %v300_v0 }
  0x58   :  { %3896 = vst [vmem:[#allocation90_spill] sm:$0xff] %v2817_v18  ;;  %v1216_v42 = vsub.f32 %v2571_v5, %v3719_v28  ;;  %v3721_v3 = vand.u32 4294901760, %v2583_v40  ;;  %v313_v8 = vand.u32 4294901760, %v312_v32  ;;  %v1205_v18 = vand.u32 4294901760, %v1204_v7  ;;  %v3947_v5 = vld [vmem:[#allocation54_spill] sm:$0xff] }
  0x59   :  { %3897 = vst [vmem:[#allocation91_spill] sm:$0xff] %v2831_v63  ;;  %v306_v22 = vsub.f32 %v2577_v12, %v3720_v46  ;;  %v318_v26 = vsub.f32 %v2579_v37, %v3722_v21  ;;  %v3723_v25 = vand.u32 4294901760, %v2587_v27  ;;  %v3727_v0 = vand.u32 4294901760, %v2591_v48  ;;  %v3948_v37 = vld [vmem:[#allocation57_spill] sm:$0xff] }
  0x5a   :  { %v1217_v14 = vand.u32 4294901760, %v1216_v42  ;;  %v1210_v38 = vsub.f32 %v2583_v40, %v3721_v3  ;;  %v2848_v28 = vpack.c.bf16 %v313_v8, %v301_v36  ;;  %v3726_v63 = vand.u32 4294901760, %v2593_v58  ;;  %v3902_v36 = vld [vmem:[#allocation43_spill] sm:$0xff] }
  0x5b   :  { %v307_v32 = vand.u32 4294901760, %v306_v22  ;;  %v319_v7 = vand.u32 4294901760, %v318_v26  ;;  %v1222_v42 = vsub.f32 %v2587_v27, %v3723_v25  ;;  %v324_v3 = vsub.f32 %v2591_v48, %v3727_v0  ;;  %v3901_v22 = vld [vmem:[#allocation42_spill] sm:$0xff] }
  0x5c   :  { %3898 = vst [vmem:[#allocation92_spill] sm:$0xff] %v2848_v28  ;;  %v2851_v46 = vpack.c.bf16 %v1217_v14, %v1205_v18  ;;  %v1211_v29 = vand.u32 4294901760, %v1210_v38  ;;  %v336_v8 = vsub.f32 %v2593_v58, %v3726_v63  ;;  %v3732_v26 = vand.u32 4294901760, %v3901_v22  ;;  %v3905_v63 = vld [vmem:[#allocation47_spill] sm:$0xff] }
  0x5d   :  { %v2859_v21 = vpack.c.bf16 %v319_v7, %v307_v32  ;;  %v3734_v14 = vand.u32 4294901760, %v3902_v36  ;;  %v1223_v18 = vand.u32 4294901760, %v1222_v42  ;;  %v325_v38 = vand.u32 4294901760, %v324_v3 }
  0x5e   :  { %3899 = vst [vmem:[#allocation93_spill] sm:$0xff] %v2851_v46  ;;  %v3903_v46 = vld [vmem:[#allocation45_spill] sm:$0xff]  ;;  %v3738_v25 = vand.u32 4294901760, %v3904_v43  ;;  %v337_v27 = vand.u32 4294901760, %v336_v8  ;;  %v1228_v32 = vsub.f32 %v3901_v22, %v3732_v26  ;;  %v3740_v0 = vand.u32 4294901760, %v3905_v63 }
  0x5f   :  { %3900 = vst [vmem:[#allocation94_spill] sm:$0xff] %v2859_v21  ;;  %v3735_v28 = vand.u32 4294901760, %v3903_v46  ;;  %v1240_v7 = vsub.f32 %v3902_v36, %v3734_v14  ;;  %v2875_v21 = vpack.c.bf16 %v1223_v18, %v1211_v29  ;;  %v3907_v8 = vld [vmem:[#allocation49_spill] sm:$0xff] }
  0x60   :  { %v342_v42 = vsub.f32 %v3904_v43, %v3738_v25  ;;  %v3741_v58 = vand.u32 4294901760, %v3907_v8  ;;  %v2884_v48 = vpack.c.bf16 %v337_v27, %v325_v38  ;;  %v1229_v26 = vand.u32 4294901760, %v1228_v32  ;;  %v3911_v43 = vld [vmem:[#allocation52_spill] sm:$0xff]  ;;  %v3912_v38 = vld [vmem:[#allocation54_spill] sm:$0xff] }
  0x61   :  { %3906 = vst [vmem:[#allocation95_spill] sm:$0xff] %v2875_v21  ;;  %v330_v3 = vsub.f32 %v3903_v46, %v3735_v28  ;;  %v1241_v22 = vand.u32 4294901760, %v1240_v7  ;;  %v1234_v14 = vsub.f32 %v3905_v63, %v3740_v0  ;;  %v3909_v21 = vld [vmem:[#allocation51_spill] sm:$0xff]  ;;  %v3746_v27 = vand.u32 4294901760, %v3911_v43 }
  0x62   :  { %3908 = vst [vmem:[#allocation96_spill] sm:$0xff] %v2884_v48  ;;  %v343_v18 = vand.u32 4294901760, %v342_v42  ;;  %v1246_v28 = vsub.f32 %v3907_v8, %v3741_v58  ;;  %v3742_v46 = vand.u32 4294901760, %v3909_v21  ;;  %v3747_v32 = vand.u32 4294901760, %v3912_v38  ;;  %v3914_v42 = vld [vmem:[#allocation55_spill] sm:$0xff] }
  0x63   :  { %v331_v29 = vand.u32 4294901760, %v330_v3  ;;  %v2893_v36 = vpack.c.bf16 %v1241_v22, %v1229_v26  ;;  %v1235_v25 = vand.u32 4294901760, %v1234_v14  ;;  %v3749_v0 = vand.u32 4294901760, %v3914_v42  ;;  %v3915_v26 = vld [vmem:[#allocation57_spill] sm:$0xff] }
  0x64   :  { %v1247_v48 = vand.u32 4294901760, %v1246_v28  ;;  %v348_v3 = vsub.f32 %v3909_v21, %v3742_v46  ;;  %v360_v58 = vsub.f32 %v3911_v43, %v3746_v27  ;;  %v1252_v22 = vsub.f32 %v3912_v38, %v3747_v32 }
  0x65   :  { %3910 = vst [vmem:[#allocation97_spill] sm:$0xff] %v2893_v36  ;;  %v2897_v7 = vpack.c.bf16 %v343_v18, %v331_v29  ;;  %v3750_v14 = vand.u32 4294901760, %v3915_v26  ;;  %v3916_v36 = vld [vmem:[#allocation58_spill] sm:$0xff]  ;;  %v1264_v46 = vsub.f32 %v3914_v42, %v3749_v0 }
  0x66   :  { %v3753_v29 = vand.u32 4294901760, %v3916_v36  ;;  %v2911_v18 = vpack.c.bf16 %v1247_v48, %v1235_v25  ;;  %v349_v28 = vand.u32 4294901760, %v348_v3  ;;  %v361_v8 = vand.u32 4294901760, %v360_v58 }
  0x67   :  { %3913 = vst [vmem:[#allocation52_spill] sm:$0xff] %v2897_v7  ;;  %v3918_v7 = vld [vmem:[#allocation59_spill] sm:$0xff]  ;;  %v1253_v63 = vand.u32 4294901760, %v1252_v22  ;;  %v354_v27 = vsub.f32 %v3915_v26, %v3750_v14  ;;  %v1265_v38 = vand.u32 4294901760, %v1264_v46  ;;  %v3754_v25 = vand.u32 4294901760, %v2643_v44 }
  0x68   :  { %3917 = vst [vmem:[#allocation55_spill] sm:$0xff] %v2911_v18  ;;  %v3752_v21 = vand.u32 4294901760, %v3918_v7  ;;  %v366_v32 = vsub.f32 %v3916_v36, %v3753_v29  ;;  %v3758_v3 = vand.u32 4294901760, %v2647_v13  ;;  %v2928_v0 = vpack.c.bf16 %v361_v8, %v349_v28  ;;  %v3923_v28 = vld [vmem:[#allocation66_spill] sm:$0xff] }
  0x69   :  { %v355_v58 = vand.u32 4294901760, %v354_v27  ;;  %v3757_v18 = vand.u32 4294901760, %v2649_v62  ;;  %v2931_v14 = vpack.c.bf16 %v1265_v38, %v1253_v63  ;;  %v1270_v46 = vsub.f32 %v2643_v44, %v3754_v25  ;;  %v3922_v27 = vld [vmem:[#allocation65_spill] sm:$0xff] }
  0x6a   :  { %v1258_v48 = vsub.f32 %v3918_v7, %v3752_v21  ;;  %3919 = vst [vmem:[#allocation58_spill] sm:$0xff] %v2928_v0  ;;  %v367_v22 = vand.u32 4294901760, %v366_v32  ;;  %v372_v21 = vsub.f32 %v2647_v13, %v3758_v3  ;;  %v3759_v32 = vand.u32 4294901760, %v3922_v27  ;;  %v3924_v0 = vld [vmem:[#allocation69_spill] sm:$0xff] }
  0x6b   :  { %3920 = vst [vmem:[#allocation59_spill] sm:$0xff] %v2931_v14  ;;  %v384_v8 = vsub.f32 %v2649_v62, %v3757_v18  ;;  %v3761_v63 = vand.u32 4294901760, %v3923_v28  ;;  %v1271_v38 = vand.u32 4294901760, %v1270_v46  ;;  %v3762_v14 = vand.u32 4294901760, %v2661_v49 }
  0x6c   :  { %v1259_v26 = vand.u32 4294901760, %v1258_v48  ;;  %v2939_v29 = vpack.c.bf16 %v367_v22, %v355_v58  ;;  %v373_v48 = vand.u32 4294901760, %v372_v21  ;;  %v3765_v25 = vand.u32 4294901760, %v3924_v0 }
  0x6d   :  { %v385_v44 = vand.u32 4294901760, %v384_v8  ;;  %v1276_v58 = vsub.f32 %v3922_v27, %v3759_v32  ;;  %v1288_v22 = vsub.f32 %v3923_v28, %v3761_v63  ;;  %v3768_v18 = vand.u32 4294901760, %v2667_v6 }
  0x6e   :  { %3921 = vst [vmem:[#allocation98_spill] sm:$0xff] %v2939_v29  ;;  %v2955_v3 = vpack.c.bf16 %v1271_v38, %v1259_v26  ;;  %v378_v21 = vsub.f32 %v2661_v49, %v3762_v14  ;;  %v390_v46 = vsub.f32 %v3924_v0, %v3765_v25  ;;  %v3766_v8 = vand.u32 4294901760, %v2671_v55 }
  0x6f   :  { %v2964_v29 = vpack.c.bf16 %v385_v44, %v373_v48  ;;  %v1277_v32 = vand.u32 4294901760, %v1276_v58  ;;  %v1289_v27 = vand.u32 4294901760, %v1288_v22  ;;  %v1282_v63 = vsub.f32 %v2667_v6, %v3768_v18 }
  0x70   :  { %3925 = vst [vmem:[#allocation69_spill] sm:$0xff] %v2955_v3  ;;  %v379_v26 = vand.u32 4294901760, %v378_v21  ;;  %v391_v38 = vand.u32 4294901760, %v390_v46  ;;  %v1294_v14 = vsub.f32 %v2671_v55, %v3766_v8  ;;  %v3767_v3 = vand.u32 4294901760, %v2675_v57 }
  0x71   :  { %3926 = vst [vmem:[#allocation99_spill] sm:$0xff] %v2964_v29  ;;  %v2973_v49 = vpack.c.bf16 %v1289_v27, %v1277_v32  ;;  %v1283_v25 = vand.u32 4294901760, %v1282_v63  ;;  %v3769_v44 = vand.u32 4294901760, %v2677_v30  ;;  %v3770_v48 = vand.u32 4294901760, %v2681_v24  ;;  %v3933_v29 = vld [vmem:[#allocation12_spill] sm:$0xff] }
  0x72   :  { %v2977_v58 = vpack.c.bf16 %v391_v38, %v379_v26  ;;  %v1295_v22 = vand.u32 4294901760, %v1294_v14  ;;  %v396_v21 = vsub.f32 %v2675_v57, %v3767_v3  ;;  %v3771_v46 = vand.u32 4294901760, %v2683_v39 }
  0x73   :  { %3927 = vst [vmem:[#allocation100_spill] sm:$0xff] %v2973_v49  ;;  %v408_v8 = vsub.f32 %v2677_v30, %v3769_v44  ;;  %v1300_v27 = vsub.f32 %v2681_v24, %v3770_v48  ;;  %v3772_v32 = vand.u32 4294901760, %v2689_v50  ;;  %v3773_v63 = vand.u32 4294901760, %v2691_v16 }
  0x74   :  { %3928 = vst [vmem:[#allocation101_spill] sm:$0xff] %v2977_v58  ;;  %v2991_v26 = vpack.c.bf16 %v1295_v22, %v1283_v25  ;;  %v397_v14 = vand.u32 4294901760, %v396_v21  ;;  %v1312_v38 = vsub.f32 %v2683_v39, %v3771_v46  ;;  %v3776_v3 = vand.u32 4294901760, %v2698_v52 }
  0x75   :  { %v409_v18 = vand.u32 4294901760, %v408_v8  ;;  %v1301_v58 = vand.u32 4294901760, %v1300_v27  ;;  %v402_v44 = vsub.f32 %v2689_v50, %v3772_v32  ;;  %v414_v48 = vsub.f32 %v2691_v16, %v3773_v63  ;;  %v3932_v63 = vld [vmem:[#allocation11_spill] sm:$0xff] }
  0x76   :  { %3929 = vst [vmem:[#allocation102_spill] sm:$0xff] %v2991_v26  ;;  %v1313_v49 = vand.u32 4294901760, %v1312_v38  ;;  %v1306_v25 = vsub.f32 %v2698_v52, %v3776_v3  ;;  %v3777_v22 = vand.u32 4294901760, %v2705_v10  ;;  %v3938_v16 = vld [vmem:[#allocation39_spill] sm:$0xff]  ;;  %v3954_v28 = vand.u32 4294901760, %v2482_v23 }
  0x77   :  { %v3007_v21 = vpack.c.bf16 %v409_v18, %v397_v14  ;;  %v403_v46 = vand.u32 4294901760, %v402_v44  ;;  %v415_v8 = vand.u32 4294901760, %v414_v48  ;;  %v3935_v18 = vld [vmem:[#allocation14_spill] sm:$0xff]  ;;  %v3952_v27 = vld [vmem:[#allocation79_spill] sm:$0xff]  ;;  %v3957_v55 = vand.u32 4294901760, %v3933_v29 }
  0x78   :  { %v3011_v26 = vpack.c.bf16 %v1313_v49, %v1301_v58  ;;  %v1307_v32 = vand.u32 4294901760, %v1306_v25  ;;  %v1318_v38 = vsub.f32 %v2705_v10, %v3777_v22  ;;  %v3937_v58 = vld [vmem:[#allocation37_spill] sm:$0xff]  ;;  %v3940_v22 = vld [vmem:[#allocation42_spill] sm:$0xff]  ;;  %v3959_v14 = vand.u32 4294901760, %v2492_v31 }
  0x79   :  { %3930 = vst [vmem:[#allocation103_spill] sm:$0xff] %v3007_v21  ;;  %v3018_v3 = vpack.c.bf16 %v415_v8, %v403_v46  ;;  %v3945_v25 = vld [vmem:[#allocation49_spill] sm:$0xff]  ;;  %v3956_v46 = vand.u32 4294901760, %v3932_v63  ;;  %v3960_v39 = vand.u32 4294901760, %v3935_v18 }
  0x7a   :  { %3931 = vst [vmem:[#allocation104_spill] sm:$0xff] %v3011_v26  ;;  %v1319_v48 = vand.u32 4294901760, %v1318_v38  ;;  %v3944_v26 = vld [vmem:[#allocation47_spill] sm:$0xff]  ;;  %v3962_v38 = vand.u32 4294901760, %v2498_v35 }
  0x7b   :  { %3934 = vst [vmem:[#allocation11_spill] sm:$0xff] %v3018_v3  ;;  %v3950_v3 = vld [vmem:[#allocation65_spill] sm:$0xff]  ;;  %v3092_v8 = vpack.c.bf16 %v3957_v55, %v3956_v46  ;;  %v3098_v44 = vpack.c.bf16 %v3960_v39, %v3959_v14  ;;  %v3968_v55 = vand.u32 4294901760, %v2513_v53  ;;  %v3969_v46 = vand.u32 4294901760, %v2515_v54 }
  0x7c   :  { %v3040_v49 = vpack.c.bf16 %v1319_v48, %v1307_v32  ;;  %v3942_v32 = vld [vmem:[#allocation45_spill] sm:$0xff]  ;;  %v3951_v48 = vld [vmem:[#allocation68_spill] sm:$0xff]  ;;  %v3971_v39 = vand.u32 4294901760, %v2521_v59  ;;  %v3972_v14 = vand.u32 4294901760, %v2523_v60 }
  0x7d   :  { %3958 = vst [vmem:[#allocation37_spill] sm:$0xff] %v3092_v8  ;;  %3961 = vst [vmem:[#allocation39_spill] sm:$0xff] %v3098_v44  ;;  %v3116_v8 = vpack.c.bf16 %v3969_v46, %v3968_v55  ;;  %v3980_v55 = vand.u32 4294901760, %v2541_v19  ;;  %v3981_v46 = vand.u32 4294901760, %v2543_v20 }
  0x7e   :  { %3936 = vst [vmem:[#allocation12_spill] sm:$0xff] %v3040_v49  ;;  %v3953_v49 = vand.u32 4294901760, %v2478_v15  ;;  %v3963_v15 = vand.u32 4294901760, %v2503_v45  ;;  %v3122_v44 = vpack.c.bf16 %v3972_v14, %v3971_v39  ;;  %v3983_v39 = vand.u32 4294901760, %v2549_v33 }
  0x7f   :  { %3970 = vst [vmem:[#allocation49_spill] sm:$0xff] %v3116_v8  ;;  %v3140_v8 = vpack.c.bf16 %v3981_v46, %v3980_v55  ;;  %v3984_v14 = vand.u32 4294901760, %v2551_v34  ;;  %v3993_v55 = vand.u32 4294901760, %v2569_v4  ;;  %v3994_v46 = vld [vmem:[#allocation31_spill] sm:$0xff] }
  0x80   :  { %v3086_v21 = vpack.c.bf16 %v3954_v28, %v3953_v49  ;;  %v3104_v10 = vpack.c.bf16 %v3963_v15, %v3962_v38  ;;  %v3965_v28 = vand.u32 4294901760, %v2507_v47  ;;  %v3966_v49 = vand.u32 4294901760, %v2509_v51  ;;  %3973 = vst [vmem:[#allocation54_spill] sm:$0xff] %v3122_v44 }
  0x81   :  { %v3974_v15 = vand.u32 4294901760, %v2527_v2  ;;  %v3975_v38 = vand.u32 4294901760, %v2531_v9  ;;  %3982 = vst [vmem:[#allocation105_spill] sm:$0xff] %v3140_v8  ;;  %v3146_v44 = vpack.c.bf16 %v3984_v14, %v3983_v39  ;;  %v3995_v8 = vand.u32 4294901760, %v3994_v46  ;;  %v3998_v14 = vld [vmem:[#allocation34_spill] sm:$0xff] }
  0x82   :  { %3955 = vst [vmem:[#allocation14_spill] sm:$0xff] %v3086_v21  ;;  %3964 = vst [vmem:[#allocation42_spill] sm:$0xff] %v3104_v10  ;;  %v3110_v21 = vpack.c.bf16 %v3966_v49, %v3965_v28  ;;  %v3977_v28 = vand.u32 4294901760, %v2535_v11  ;;  %v3978_v49 = vand.u32 4294901760, %v2537_v17  ;;  %v3997_v39 = vand.u32 4294901760, %v2577_v12 }
  0x83   :  { %v3128_v10 = vpack.c.bf16 %v3975_v38, %v3974_v15  ;;  %3985 = vst [vmem:[#allocation106_spill] sm:$0xff] %v3146_v44  ;;  %v3986_v15 = vand.u32 4294901760, %v2555_v41  ;;  %v3987_v38 = vand.u32 4294901760, %v2559_v56  ;;  %v3164_v33 = vpack.c.bf16 %v3995_v8, %v3993_v55 }
  0x84   :  { %3967 = vst [vmem:[#allocation47_spill] sm:$0xff] %v3110_v21  ;;  %v3134_v21 = vpack.c.bf16 %v3978_v49, %v3977_v28  ;;  %v3989_v28 = vand.u32 4294901760, %v2563_v61  ;;  %v3990_v49 = vld [vmem:[#allocation28_spill] sm:$0xff]  ;;  %v3999_v44 = vand.u32 4294901760, %v3998_v14  ;;  %v28_v8 = vlaneseq }
  0x85   :  { %3976 = vst [vmem:[#allocation57_spill] sm:$0xff] %v3128_v10  ;;  %v3152_v10 = vpack.c.bf16 %v3987_v38, %v3986_v15  ;;  %3996 = vst [vmem:[#allocation31_spill] sm:$0xff] %v3164_v33  ;;  %v4001_v15 = vand.u32 4294901760, %v2583_v40  ;;  %v4002_v38 = vand.u32 4294901760, %v3937_v58  ;;  %v4008_v55 = vand.u32 4294901760, %v3940_v22  ;;  %v4009_v33 = vld [vmem:[#allocation43_spill] sm:$0xff] }
  0x86   :  { %3979 = vst [vmem:[#allocation79_spill] sm:$0xff] %v3134_v21  ;;  %v3991_v21 = vand.u32 4294901760, %v3990_v49  ;;  %v3170_v41 = vpack.c.bf16 %v3999_v44, %v3997_v39  ;;  %v4010_v12 = vand.u32 4294901760, %v4009_v33  ;;  %v4012_v44 = vand.u32 4294901760, %v3942_v32  ;;  %v4013_v39 = vld [vmem:[#allocation46_spill] sm:$0xff] }
  0x87   :  { %3988 = vst [vmem:[#allocation107_spill] sm:$0xff] %v3152_v10  ;;  %v3176_v10 = vpack.c.bf16 %v4002_v38, %v4001_v15  ;;  %v4016_v15 = vand.u32 4294901760, %v3944_v26  ;;  %v4017_v38 = vand.u32 4294901760, %v3945_v25 }
  0x88   :  { %v3158_v19 = vpack.c.bf16 %v3991_v21, %v3989_v28  ;;  %4000 = vst [vmem:[#allocation108_spill] sm:$0xff] %v3170_v41  ;;  %v4004_v21 = vand.u32 4294901760, %v3938_v16  ;;  %v4005_v28 = vld [vmem:[#allocation40_spill] sm:$0xff]  ;;  %v3188_v14 = vpack.c.bf16 %v4010_v12, %v4008_v55  ;;  %v4014_v41 = vand.u32 4294901760, %v4013_v39 }
  0x89   :  { %4003 = vst [vmem:[#allocation109_spill] sm:$0xff] %v3176_v10  ;;  %v3200_v10 = vpack.c.bf16 %v4017_v38, %v4016_v15  ;;  %v29_v12 = vand.u32 127, %v28_v8  ;;  %v4022_v55 = vand.u32 4294901760, %v3947_v5  ;;  %v4028_v15 = vand.u32 4294901760, %v3918_v7  ;;  %v4029_v38 = vld [vmem:[#allocation61_spill] sm:$0xff] }
  0x8a   :  { %3992 = vst [vmem:[#allocation28_spill] sm:$0xff] %v3158_v19  ;;  %v4006_v19 = vand.u32 4294901760, %v4005_v28  ;;  %4011 = vst [vmem:[#allocation43_spill] sm:$0xff] %v3188_v14  ;;  %v3194_v40 = vpack.c.bf16 %v4014_v41, %v4012_v44  ;;  %v4023_v14 = vand.u32 4294901760, %v3914_v42  ;;  %v4025_v41 = vand.u32 4294901760, %v3948_v37 }
  0x8b   :  { %4018 = vst [vmem:[#allocation110_spill] sm:$0xff] %v3200_v10  ;;  %v4026_v44 = vand.u32 4294901760, %v3916_v36  ;;  %v4030_v10 = vand.u32 4294901760, %v4029_v38  ;;  %v4032_v8 = vand.u32 4294901760, %v2647_v13 }
  0x8c   :  { %v3182_v4 = vpack.c.bf16 %v4006_v19, %v4004_v21  ;;  %4015 = vst [vmem:[#allocation46_spill] sm:$0xff] %v3194_v40  ;;  %v4019_v19 = vand.u32 4294901760, %v3946_v1  ;;  %v4020_v21 = vand.u32 4294901760, %v3911_v43  ;;  %v3212_v32 = vpack.c.bf16 %v4023_v14, %v4022_v55 }
  0x8d   :  { %v3218_v40 = vpack.c.bf16 %v4026_v44, %v4025_v41  ;;  %v3224_v1 = vpack.c.bf16 %v4030_v10, %v4028_v15  ;;  %v4037_v55 = vand.u32 4294901760, %v3950_v3  ;;  %v4038_v41 = vld [vmem:[#allocation66_spill] sm:$0xff]  ;;  %v4041_v10 = vand.u32 4294901760, %v3951_v48 }
  0x8e   :  { %4007 = vst [vmem:[#allocation40_spill] sm:$0xff] %v3182_v4  ;;  %v3206_v4 = vpack.c.bf16 %v4020_v21, %v4019_v19  ;;  %4024 = vst [vmem:[#allocation112_spill] sm:$0xff] %v3212_v32  ;;  %v4033_v21 = vand.u32 4294901760, %v2649_v62  ;;  %v4039_v44 = vand.u32 4294901760, %v4038_v41  ;;  %v4042_v15 = vand.u32 4294901760, %v3924_v0 }
  0x8f   :  { %4027 = vst [vmem:[#allocation113_spill] sm:$0xff] %v3218_v40  ;;  %4031 = vst [vmem:[#allocation61_spill] sm:$0xff] %v3224_v1  ;;  %v4044_v32 = vmov 0.0  }
  0x90   :  { %4021 = vst [vmem:[#allocation111_spill] sm:$0xff] %v3206_v4  ;;  %v3230_v4 = vpack.c.bf16 %v4033_v21, %v4032_v8  ;;  %v3240_v40 = vpack.c.bf16 %v4039_v44, %v4037_v55  ;;  %v3246_v1 = vpack.c.bf16 %v4042_v15, %v4041_v10  ;;  %v4046_v21 = vld [vmem:[#allocation71_spill] sm:$0xff]  ;;  %v4049_v44 = vand.u32 4294901760, %v2675_v57 }
  0x91   :  { %v4060_v57 = vand.u32 4294901760, %v3952_v27 }
  0x92   :  { %4034 = vst [vmem:[#allocation114_spill] sm:$0xff] %v3230_v4  ;;  %4040 = vst [vmem:[#allocation66_spill] sm:$0xff] %v3240_v40  ;;  %v4047_v4 = vand.u32 4294901760, %v4046_v21  ;;  %v4050_v40 = vand.u32 4294901760, %v2677_v30 }
  0x93   :  { %4043 = vst [vmem:[#allocation115_spill] sm:$0xff] %v3246_v1  ;;  %v4055_v1 = vand.u32 4294901760, %v2681_v24 }
  0x94   :  { %v32_v19 = vpop.permute.xlu0 %31  ;;  %v3263_v48 = vpack.c.bf16 %v4050_v40, %v4049_v44 }
  0x95   :  { %vm3232_vm0 = vcmp.eq.s32.totalorder %v29_v12, %v32_v19  ;;  %v4045_v19 = vand.u32 4294901760, %v2667_v6 }
  0x96   :  { %v1939_v8 = vsel %vm3232_vm0, 1.0, %v4044_v32  ;;  %4051 = vst [vmem:[#allocation116_spill] sm:$0xff] %v3263_v48 }
  0x97   :  { %v3255_v13 = vpack.c.bf16 %v4047_v4, %v4045_v19  ;;  %v3257_v3 = vsub.f32 %v1939_v8, %v1939_v8  ;;  %v4056_v4 = vld [vmem:[#allocation76_spill] sm:$0xff] }
  0x98   :  { %v35_v55 = vpop.permute.xlu0 %34  ;;  %v4057_v19 = vand.u32 4294901760, %v4056_v4 }
  0x99   :  { %4048 = vst [vmem:[#allocation71_spill] sm:$0xff] %v3255_v13  ;;  %vm3265_vm1 = vcmp.eq.s32.totalorder %v29_v12, %v35_v55  ;;  %v3270_v15 = vand.u32 4294901760, %v3257_v3  ;;  %v4059_v13 = vand.u32 4294901760, %v2689_v50  ;;  %v4062_v12 = vand.u32 4294901760, %v2698_v52  ;;  %v4063_v55 = vld [vmem:[#allocation81_spill] sm:$0xff] }
  0x9a   :  { %v3276_v8 = vpack.c.bf16 %v4057_v19, %v4055_v1  ;;  %v1940_v40 = vsel %vm3265_vm1, 1.0, %v4044_v32  ;;  %v4064_v44 = vand.u32 4294901760, %v4063_v55 }
  0x9b   :  { %4054 = vst [vmem:[#allocation117_spill] sm:$0xff] %v3270_v15  ;;  %v3282_v30 = vpack.c.bf16 %v4060_v57, %v4059_v13  ;;  %v206_v1 = vsub.f32 %v3257_v3, %v3270_v15  ;;  %v3295_v19 = vsub.f32 %v1940_v40, %v1940_v40  ;;  %v4067_v57 = vld [vmem:[#allocation82_spill] sm:$0xff]  ;;  %v4070_v40 = vld [vmem:[#allocation85_spill] sm:$0xff] }
  0x9c   :  { %4058 = vst [vmem:[#allocation76_spill] sm:$0xff] %v3276_v8  ;;  %v3291_v48 = vpack.c.bf16 %v4064_v44, %v4062_v12  ;;  %v4069_v12 = vld [vmem:[#allocation84_spill] sm:$0xff]  ;;  %v4085_v15 = vld [vmem:[#allocation58_spill] sm:$0xff] }
  0x9d   :  { %4061 = vst [vmem:[#allocation118_spill] sm:$0xff] %v3282_v30  ;;  %v207_v8 = vand.u32 4294901760, %v206_v1  ;;  %v3298_v50 = vand.u32 4294901760, %v3295_v19  ;;  %v4068_v30 = vld [vmem:[#allocation83_spill] sm:$0xff]  ;;  %v4071_v1 = vld [vmem:[#allocation86_spill] sm:$0xff] }
  0x9e   :  { %4065 = vst [vmem:[#allocation81_spill] sm:$0xff] %v3291_v48  ;;  %v4073_v48 = vld [vmem:[#allocation88_spill] sm:$0xff] }
  0x9f   :  { %4066 = vst [vmem:[#allocation119_spill] sm:$0xff] %v3298_v50  ;;  %208 = vmatmul.mubr.f32.vlgmr.msra.gmra.mrb[0].mxu0 %v207_v8  ;;  %1112 = vmatmul.mubr.f32.vlgmr.msra.gmra.mrb[0].mxu1 %v207_v8  ;;  %v217_v13 = vsub.f32 %v3295_v19, %v3298_v50  ;;  %v4072_v8 = vld [vmem:[#allocation87_spill] sm:$0xff] }
  0xa0   :  { %1988 = vmatpush1.bf16.msra.mxu0 %v4067_v57  ;;  %2180 = vmatpush1.bf16.msra.mxu1 %v4068_v30  ;;  %v4074_v57 = vld [vmem:[#allocation89_spill] sm:$0xff]  ;;  %v4075_v30 = vld [vmem:[#allocation90_spill] sm:$0xff]  ;;  %v4084_v50 = vld [vmem:[#allocation55_spill] sm:$0xff] }
  0xa1   :  { %213 = vmatprep.mubr.f32.mxu0 %v4044_v32  ;;  %1990 = vmatprep.subr.bf16.mxu0 %v4069_v12  ;;  %v218_v44 = vand.u32 4294901760, %v217_v13  ;;  %v4076_v13 = vld [vmem:[#allocation91_spill] sm:$0xff]  ;;  %v4077_v12 = vld [vmem:[#allocation92_spill] sm:$0xff] }
  0xa2   :  { %1117 = vmatprep.mubr.f32.mxu1 %v4044_v32  ;;  %2182 = vmatprep.subr.bf16.mxu1 %v4070_v40  ;;  %v4078_v40 = vld [vmem:[#allocation93_spill] sm:$0xff] }
  0xa3   :  { %219 = vmatmul.mubr.f32.gmra.mrb[2].mxu0 %v218_v44  ;;  %1123 = vmatmul.mubr.f32.gmra.mrb[2].mxu1 %v218_v44  ;;  %v4079_v44 = vld [vmem:[#allocation94_spill] sm:$0xff] }
  0xa4   :  { %1992 = vmatpush1.bf16.msra.mxu0 %v4071_v1  ;;  %2184 = vmatpush1.bf16.msra.mxu1 %v4072_v8  ;;  %v4080_v1 = vld [vmem:[#allocation95_spill] sm:$0xff]  ;;  %v4081_v8 = vld [vmem:[#allocation96_spill] sm:$0xff] }
  0xa5   :  { %1994 = vmatprep.subr.bf16.mxu0 %v4073_v48  ;;  %2186 = vmatprep.subr.bf16.mxu1 %v4074_v57  ;;  %v4082_v48 = vld [vmem:[#allocation97_spill] sm:$0xff]  ;;  %v4083_v57 = vld [vmem:[#allocation52_spill] sm:$0xff] }
  0xa6   :  { %449 = vmatprep.mubr.f32.mxu0 %v4044_v32  ;;  %1353 = vmatprep.mubr.f32.mxu1 %v4044_v32 }
  0xa8   :  { %1996 = vmatpush1.bf16.msra.mxu0 %v4075_v30  ;;  %2188 = vmatpush1.bf16.msra.mxu1 %v4076_v13  ;;  %v4086_v30 = vld [vmem:[#allocation59_spill] sm:$0xff]  ;;  %v4087_v13 = vld [vmem:[#allocation98_spill] sm:$0xff] }
  0xa9   :  { %1998 = vmatprep.subr.bf16.mxu0 %v4077_v12  ;;  %2190 = vmatprep.subr.bf16.mxu1 %v4078_v40  ;;  %v4088_v12 = vld [vmem:[#allocation69_spill] sm:$0xff]  ;;  %v4089_v40 = vld [vmem:[#allocation99_spill] sm:$0xff] }
  0xac   :  { %2000 = vmatpush1.bf16.msra.mxu0 %v4079_v44  ;;  %2192 = vmatpush1.bf16.msra.mxu1 %v4080_v1  ;;  %v4090_v44 = vld [vmem:[#allocation100_spill] sm:$0xff]  ;;  %v4091_v1 = vld [vmem:[#allocation101_spill] sm:$0xff] }
  0xad   :  { %2002 = vmatprep.subr.bf16.mxu0 %v4081_v8  ;;  %2194 = vmatprep.subr.bf16.mxu1 %v4082_v48  ;;  %v4092_v8 = vld [vmem:[#allocation102_spill] sm:$0xff]  ;;  %v4093_v48 = vld [vmem:[#allocation103_spill] sm:$0xff] }
  0xb0   :  { %2004 = vmatpush1.bf16.msra.mxu0 %v4083_v57  ;;  %2196 = vmatpush1.bf16.msra.mxu1 %v4084_v50  ;;  %v4094_v57 = vld [vmem:[#allocation104_spill] sm:$0xff]  ;;  %v4095_v50 = vld [vmem:[#allocation11_spill] sm:$0xff] }
  0xb1   :  { %2006 = vmatprep.subr.bf16.mxu0 %v4085_v15  ;;  %2198 = vmatprep.subr.bf16.mxu1 %v4086_v30  ;;  %v4096_v15 = vld [vmem:[#allocation12_spill] sm:$0xff] }
  0xb2   :  { %v4097_v30 = vld [vmem:[#allocation8_spill] sm:$0xff] }
  0xb4   :  { %2008 = vmatpush1.bf16.msra.mxu0 %v4087_v13  ;;  %2200 = vmatpush1.bf16.msra.mxu1 %v4088_v12  ;;  %v4098_v13 = vpack.c.bf16 %v2482_v23, %v4097_v30  ;;  %v4099_v12 = vpack.c.bf16 %v3933_v29, %v3932_v63  ;;  %v4101_v23 = vpack.c.bf16 %v2503_v45, %v2498_v35  ;;  %v4156_v30 = vld [vmem:[#allocation26_spill] sm:$0xff] }
  0xb5   :  { %2010 = vmatprep.subr.bf16.mxu0 %v4089_v40  ;;  %2202 = vmatprep.subr.bf16.mxu1 %v4090_v44  ;;  %v2438_v40 = vmov 1.0   ;;  %v4100_v44 = vpack.c.bf16 %v3935_v18, %v2492_v31  ;;  %v4102_v29 = vpack.c.bf16 %v2509_v51, %v2507_v47  ;;  %v4103_v63 = vpack.c.bf16 %v2515_v54, %v2513_v53  ;;  %v4107_v47 = vld [vmem:[#allocation22_spill] sm:$0xff]  ;;  %v4109_v53 = vld [vmem:[#allocation24_spill] sm:$0xff] }
  0xb6   :  { %v4104_v31 = vpack.c.bf16 %v2523_v60, %v2521_v59  ;;  %v4105_v35 = vpack.c.bf16 %v2531_v9, %v2527_v2  ;;  %v4106_v45 = vpack.c.bf16 %v2537_v17, %v2535_v11  ;;  %v4108_v51 = vpack.c.bf16 %v2543_v20, %v4107_v47  ;;  %v4111_v59 = vld [vmem:[#allocation25_spill] sm:$0xff]  ;;  %v4114_v9 = vld [vmem:[#allocation30_spill] sm:$0xff]  ;;  %v4167_v47 = vld [vmem:[#allocation56_spill] sm:$0xff] }
  0xb7   :  { %v4110_v54 = vpack.c.bf16 %v2551_v34, %v4109_v53  ;;  %v4112_v60 = vpack.c.bf16 %v2559_v56, %v4111_v59  ;;  %v4113_v2 = vpack.c.bf16 %v3990_v49, %v2563_v61  ;;  %v4115_v11 = vpack.c.bf16 %v3994_v46, %v4114_v9  ;;  %v4116_v17 = vld [vmem:[#allocation34_spill] sm:$0xff]  ;;  %v4117_v20 = vld [vmem:[#allocation33_spill] sm:$0xff]  ;;  %v4171_v59 = vld [vmem:[#allocation67_spill] sm:$0xff] }
  0xb8   :  { %2012 = vmatpush1.bf16.msra.mxu0 %v4091_v1  ;;  %2204 = vmatpush1.bf16.msra.mxu1 %v4092_v8  ;;  %v4118_v18 = vpack.c.bf16 %v4116_v17, %v4117_v20  ;;  %v4119_v1 = vld [vmem:[#allocation35_spill] sm:$0xff]  ;;  %v4121_v56 = vpack.c.bf16 %v4005_v28, %v3938_v16  ;;  %v4122_v61 = vpack.c.bf16 %v4009_v33, %v3940_v22  ;;  %v4123_v49 = vld [vmem:[#allocation45_spill] sm:$0xff]  ;;  %v4169_v53 = vld [vmem:[#allocation62_spill] sm:$0xff] }
  0xb9   :  { %2014 = vmatprep.subr.bf16.mxu0 %v4093_v48  ;;  %2206 = vmatprep.subr.bf16.mxu1 %v4094_v57  ;;  %v4120_v34 = vpack.c.bf16 %v3937_v58, %v4119_v1  ;;  %v4124_v46 = vpack.c.bf16 %v4013_v39, %v4123_v49  ;;  %v4125_v8 = vpack.c.bf16 %v3945_v25, %v3944_v26  ;;  %v4126_v48 = vld [vmem:[#allocation51_spill] sm:$0xff]  ;;  %v4133_v25 = vld [vmem:[#allocation65_spill] sm:$0xff]  ;;  %v4135_v39 = vld [vmem:[#allocation68_spill] sm:$0xff] }
  0xba   :  { %v4127_v58 = vpack.c.bf16 %v3911_v43, %v4126_v48  ;;  %v4128_v16 = vpack.c.bf16 %v3914_v42, %v3947_v5  ;;  %v4129_v33 = vpack.c.bf16 %v3916_v36, %v3948_v37  ;;  %v4130_v22 = vpack.c.bf16 %v4029_v38, %v3918_v7  ;;  %v4131_v28 = vld [vmem:[#allocation63_spill] sm:$0xff]  ;;  %v4138_v36 = vld [vmem:[#allocation74_spill] sm:$0xff]  ;;  %v4139_v42 = vld [vmem:[#allocation73_spill] sm:$0xff] }
  0xbb   :  { %v4132_v26 = vpack.c.bf16 %v2649_v62, %v4131_v28  ;;  %v4134_v43 = vpack.c.bf16 %v4038_v41, %v4133_v25  ;;  %v4136_v5 = vpack.c.bf16 %v3924_v0, %v4135_v39  ;;  %v4137_v37 = vpack.c.bf16 %v4046_v21, %v2667_v6  ;;  %v4142_v38 = vld [vmem:[#allocation78_spill] sm:$0xff]  ;;  %v4145_v57 = vld [vmem:[#allocation9_spill] sm:$0xff]  ;;  %v4174_v9 = vld [vmem:[#allocation75_spill] sm:$0xff] }
  0xbc   :  { %2016 = vmatpush1.bf16.msra.mxu0 %v4095_v50  ;;  %2208 = vmatpush1.bf16.msra.mxu1 %v4096_v15  ;;  %v4140_v7 = vpack.c.bf16 %v4138_v36, %v4139_v42  ;;  %v4141_v62 = vpack.c.bf16 %v4056_v4, %v2681_v24  ;;  %v4143_v41 = vpack.c.bf16 %v3952_v27, %v4142_v38  ;;  %v4146_v6 = vld [vmem:[#allocation10_spill] sm:$0xff]  ;;  %v4147_v21 = vld [vmem:[#allocation13_spill] sm:$0xff]  ;;  %v4148_v24 = vld [vmem:[#allocation15_spill] sm:$0xff] }
  0xbd   :  { %2018 = vmatprep.subr.bf16.mxu0 %v4098_v13  ;;  %2210 = vmatprep.subr.bf16.mxu1 %v4099_v12  ;;  %v4144_v0 = vpack.c.bf16 %v4063_v55, %v2698_v52  ;;  %v4149_v27 = vld [vmem:[#allocation16_spill] sm:$0xff]  ;;  %v4150_v52 = vld [vmem:[#allocation17_spill] sm:$0xff]  ;;  %v4151_v4 = vld [vmem:[#allocation18_spill] sm:$0xff] }
  0xbe   :  { %v4152_v55 = vld [vmem:[#allocation19_spill] sm:$0xff]  ;;  %v4154_v50 = vld [vmem:[#allocation21_spill] sm:$0xff]  ;;  %v4176_v17 = vld [vmem:[#allocation80_spill] sm:$0xff] }
  0xbf   :  { %1941 = vmatmul.mubr.msk.f32.vlgmr.msra.gmra.mrb[0].mxu0 %vm3232_vm0, %v2438_v40  ;;  %1947 = vmatmul.mubr.msk.f32.vlgmr.msra.gmra.mrb[0].mxu1 %vm3232_vm0, %v2438_v40  ;;  %v4155_v15 = vld [vmem:[#allocation23_spill] sm:$0xff]  ;;  %v4158_v12 = vld [vmem:[#allocation29_spill] sm:$0xff]  ;;  %v4177_v20 = vld [vmem:[#allocation14_spill] sm:$0xff] }
  0xc0   :  { %2020 = vmatpush1.bf16.msra.mxu0 %v4100_v44  ;;  %2212 = vmatpush1.bf16.msra.mxu1 %v4101_v23  ;;  %v4157_v13 = vld [vmem:[#allocation27_spill] sm:$0xff]  ;;  %v4160_v44 = vld [vmem:[#allocation36_spill] sm:$0xff]  ;;  %v4161_v23 = vld [vmem:[#allocation38_spill] sm:$0xff] }
  0xc1   :  { %456 = vmatprep.mubr.f32.mxu0 %v4044_v32  ;;  %1360 = vmatprep.mubr.f32.mxu1 %v4044_v32  ;;  %v4179_v1 = vld [vmem:[#allocation117_spill] sm:$0xff]  ;;  %v4191_v28 = vld [vmem:[#allocation28_spill] sm:$0xff]  ;;  %v4198_v36 = vld [vmem:[#allocation110_spill] sm:$0xff] }
  0xc2   :  { %2022 = vmatprep.subr.bf16.mxu0 %v4102_v29  ;;  %2214 = vmatprep.subr.bf16.mxu1 %v4103_v63  ;;  %v4162_v29 = vld [vmem:[#allocation41_spill] sm:$0xff]  ;;  %v4163_v63 = vld [vmem:[#allocation44_spill] sm:$0xff]  ;;  %v4199_v42 = vld [vmem:[#allocation111_spill] sm:$0xff] }
  0xc3   :  { %1942 = vmatmul.mubr.msk.f32.gmra.mrb[2].mxu0 %vm3265_vm1, %v2438_v40  ;;  %1948 = vmatmul.mubr.msk.f32.gmra.mrb[2].mxu1 %vm3265_vm1, %v2438_v40  ;;  %v4183_v49 = vld [vmem:[#allocation49_spill] sm:$0xff]  ;;  %v4193_v25 = vld [vmem:[#allocation108_spill] sm:$0xff] }
  0xc4   :  { %2024 = vmatpush1.bf16.msra.mxu0 %v4104_v31  ;;  %2216 = vmatpush1.bf16.msra.mxu1 %v4105_v35  ;;  %v4164_v31 = vld [vmem:[#allocation48_spill] sm:$0xff]  ;;  %v4165_v35 = vld [vmem:[#allocation50_spill] sm:$0xff]  ;;  %v4186_v48 = vld [vmem:[#allocation57_spill] sm:$0xff] }
  0xc5   :  { %2026 = vmatprep.subr.bf16.mxu0 %v4106_v45  ;;  %2218 = vmatprep.subr.bf16.mxu1 %v4108_v51  ;;  %v4166_v45 = vld [vmem:[#allocation53_spill] sm:$0xff]  ;;  %v4168_v51 = vld [vmem:[#allocation60_spill] sm:$0xff] }
  0xc6   :  { %592 = vmatprep.mubr.f32.mxu0 %v4044_v32  ;;  %1496 = vmatprep.mubr.f32.mxu1 %v4044_v32  ;;  %v4195_v39 = vld [vmem:[#allocation40_spill] sm:$0xff]  ;;  %v4202_v38 = vld [vmem:[#allocation61_spill] sm:$0xff] }
  0xc8   :  { %2028 = vmatpush1.bf16.msra.mxu0 %v4110_v54  ;;  %2220 = vmatpush1.bf16.msra.mxu1 %v4112_v60  ;;  %v4170_v54 = vld [vmem:[#allocation64_spill] sm:$0xff]  ;;  %v4172_v60 = vld [vmem:[#allocation70_spill] sm:$0xff] }
  0xc9   :  { %2030 = vmatprep.subr.bf16.mxu0 %v4113_v2  ;;  %2222 = vmatprep.subr.bf16.mxu1 %v4115_v11  ;;  %v4173_v2 = vld [vmem:[#allocation72_spill] sm:$0xff]  ;;  %v4175_v11 = vld [vmem:[#allocation77_spill] sm:$0xff] }
  0xcc   :  { %2032 = vmatpush1.bf16.msra.mxu0 %v4118_v18  ;;  %2224 = vmatpush1.bf16.msra.mxu1 %v4120_v34  ;;  %v4178_v18 = vld [vmem:[#allocation37_spill] sm:$0xff]  ;;  %v4180_v34 = vld [vmem:[#allocation39_spill] sm:$0xff] }
  0xcd   :  { %2034 = vmatprep.subr.bf16.mxu0 %v4121_v56  ;;  %2226 = vmatprep.subr.bf16.mxu1 %v4122_v61  ;;  %v4181_v56 = vld [vmem:[#allocation42_spill] sm:$0xff]  ;;  %v4182_v61 = vld [vmem:[#allocation47_spill] sm:$0xff] }
  0xd0   :  { %2036 = vmatpush1.bf16.msra.mxu0 %v4124_v46  ;;  %2228 = vmatpush1.bf16.msra.mxu1 %v4125_v8  ;;  %v4184_v46 = vld [vmem:[#allocation119_spill] sm:$0xff]  ;;  %v4185_v8 = vld [vmem:[#allocation54_spill] sm:$0xff] }
  0xd1   :  { %2038 = vmatprep.subr.bf16.mxu0 %v4127_v58  ;;  %2230 = vmatprep.subr.bf16.mxu1 %v4128_v16  ;;  %v4187_v58 = vld [vmem:[#allocation79_spill] sm:$0xff]  ;;  %v4188_v16 = vld [vmem:[#allocation105_spill] sm:$0xff] }
  0xd4   :  { %2040 = vmatpush1.bf16.msra.mxu0 %v4129_v33  ;;  %2232 = vmatpush1.bf16.msra.mxu1 %v4130_v22  ;;  %v4189_v33 = vld [vmem:[#allocation106_spill] sm:$0xff]  ;;  %v4190_v22 = vld [vmem:[#allocation107_spill] sm:$0xff] }
  0xd5   :  { %2042 = vmatprep.subr.bf16.mxu0 %v4132_v26  ;;  %2234 = vmatprep.subr.bf16.mxu1 %v4134_v43  ;;  %v4192_v26 = vld [vmem:[#allocation31_spill] sm:$0xff]  ;;  %v4194_v43 = vld [vmem:[#allocation109_spill] sm:$0xff] }
  0xd8   :  { %2044 = vmatpush1.bf16.msra.mxu0 %v4136_v5  ;;  %2236 = vmatpush1.bf16.msra.mxu1 %v4137_v37  ;;  %v4196_v5 = vld [vmem:[#allocation43_spill] sm:$0xff]  ;;  %v4197_v37 = vld [vmem:[#allocation46_spill] sm:$0xff] }
  0xd9   :  { %2046 = vmatprep.subr.bf16.mxu0 %v4140_v7  ;;  %2238 = vmatprep.subr.bf16.mxu1 %v4141_v62  ;;  %v4200_v7 = vld [vmem:[#allocation112_spill] sm:$0xff]  ;;  %v4201_v62 = vld [vmem:[#allocation113_spill] sm:$0xff] }
  0xdc   :  { %2048 = vmatpush1.bf16.msra.mxu0 %v4143_v41  ;;  %2240 = vmatpush1.bf16.msra.mxu1 %v4144_v0  ;;  %v4203_v41 = vld [vmem:[#allocation114_spill] sm:$0xff] }
  0xdd   :  { %2050 = vmatprep.subr.bf16.mxu0 %v4145_v57  ;;  %2242 = vmatprep.subr.bf16.mxu1 %v4146_v6  ;;  %v4204_v0 = vld [vmem:[#allocation66_spill] sm:$0xff] }
  0xdf   :  { %595 = vmatmul.mubr.f32.vlgmr.msra.gmra.mrb[0].mxu0 %v3257_v3  ;;  %1499 = vmatmul.mubr.f32.vlgmr.msra.gmra.mrb[0].mxu1 %v3257_v3  ;;  %v4153_v3 = vld [vmem:[#allocation20_spill] sm:$0xff] }
  0xe0   :  { %2052 = vmatpush1.bf16.msra.mxu0 %v4147_v21  ;;  %2244 = vmatpush1.bf16.msra.mxu1 %v4148_v24 }
  0xe1   :  { %600 = vmatprep.mubr.f32.mxu0 %v4044_v32  ;;  %1504 = vmatprep.mubr.f32.mxu1 %v4044_v32 }
  0xe2   :  { %2054 = vmatprep.subr.bf16.mxu0 %v4149_v27  ;;  %2246 = vmatprep.subr.bf16.mxu1 %v4150_v52 }
  0xe3   :  { %603 = vmatmul.mubr.f32.gmra.mrb[2].mxu0 %v3295_v19  ;;  %1507 = vmatmul.mubr.f32.gmra.mrb[2].mxu1 %v3295_v19  ;;  %v4159_v19 = vld [vmem:[#allocation32_spill] sm:$0xff] }
  0xe4   :  { %2056 = vmatpush1.bf16.msra.mxu0 %v4151_v4  ;;  %2248 = vmatpush1.bf16.msra.mxu1 %v4152_v55 }
  0xe5   :  { %2058 = vmatprep.subr.bf16.mxu0 %v4153_v3  ;;  %2250 = vmatprep.subr.bf16.mxu1 %v4154_v50 }
  0xe6   :  { %705 = vmatprep.mubr.f32.mxu0 %v4044_v32  ;;  %1609 = vmatprep.mubr.f32.mxu1 %v4044_v32 }
  0xe8   :  { %2060 = vmatpush1.bf16.msra.mxu0 %v4155_v15  ;;  %2252 = vmatpush1.bf16.msra.mxu1 %v4156_v30 }
  0xe9   :  { %2062 = vmatprep.subr.bf16.mxu0 %v4157_v13  ;;  %2254 = vmatprep.subr.bf16.mxu1 %v4158_v12 }
  0xec   :  { %2064 = vmatpush1.bf16.msra.mxu0 %v4159_v19  ;;  %2256 = vmatpush1.bf16.msra.mxu1 %v4160_v44 }
  0xed   :  { %2066 = vmatprep.subr.bf16.mxu0 %v4161_v23  ;;  %2258 = vmatprep.subr.bf16.mxu1 %v4162_v29 }
  0xf0   :  { %2068 = vmatpush1.bf16.msra.mxu0 %v4163_v63  ;;  %2260 = vmatpush1.bf16.msra.mxu1 %v4164_v31 }
  0xf1   :  { %2070 = vmatprep.subr.bf16.mxu0 %v4165_v35  ;;  %2262 = vmatprep.subr.bf16.mxu1 %v4166_v45 }
  0xf4   :  { %2072 = vmatpush1.bf16.msra.mxu0 %v4167_v47  ;;  %2264 = vmatpush1.bf16.msra.mxu1 %v4168_v51 }
  0xf5   :  { %2074 = vmatprep.subr.bf16.mxu0 %v4169_v53  ;;  %2266 = vmatprep.subr.bf16.mxu1 %v4170_v54 }
  0xf8   :  { %2076 = vmatpush1.bf16.msra.mxu0 %v4171_v59  ;;  %2268 = vmatpush1.bf16.msra.mxu1 %v4172_v60 }
  0xf9   :  { %2078 = vmatprep.subr.bf16.mxu0 %v4173_v2  ;;  %2270 = vmatprep.subr.bf16.mxu1 %v4174_v9 }
  0xfc   :  { %2080 = vmatpush1.bf16.msra.mxu0 %v4175_v11  ;;  %2272 = vmatpush1.bf16.msra.mxu1 %v4176_v17 }
  0xfd   :  { %2082 = vmatprep.subr.bf16.mxu0 %v4177_v20  ;;  %2274 = vmatprep.subr.bf16.mxu1 %v4178_v18  ;;  %v4205_v20 = vld [vmem:[#allocation115_spill] sm:$0xff] }
  0xfe   :  { %v4206_v18 = vld [vmem:[#allocation71_spill] sm:$0xff] }
  0xff   :  { %709 = vmatmul.mubr.f32.vlgmr.msra.gmra.mrb[0].mxu0 %v4179_v1  ;;  %1613 = vmatmul.mubr.f32.vlgmr.msra.gmra.mrb[0].mxu1 %v4179_v1  ;;  %v4207_v1 = vld [vmem:[#allocation116_spill] sm:$0xff] }
 0x100   :  { %2084 = vmatpush1.bf16.msra.mxu0 %v4180_v34  ;;  %2276 = vmatpush1.bf16.msra.mxu1 %v4181_v56  ;;  %v4208_v34 = vld [vmem:[#allocation76_spill] sm:$0xff]  ;;  %v4209_v56 = vld [vmem:[#allocation118_spill] sm:$0xff] }
 0x101   :  { %714 = vmatprep.mubr.f32.mxu0 %v4044_v32  ;;  %1618 = vmatprep.mubr.f32.mxu1 %v4044_v32 }
 0x102   :  { %2086 = vmatprep.subr.bf16.mxu0 %v4182_v61  ;;  %2278 = vmatprep.subr.bf16.mxu1 %v4183_v49  ;;  %v4210_v61 = vld [vmem:[#allocation81_spill] sm:$0xff] }
 0x103   :  { %718 = vmatmul.mubr.f32.gmra.mrb[2].mxu0 %v4184_v46  ;;  %1622 = vmatmul.mubr.f32.gmra.mrb[2].mxu1 %v4184_v46 }
 0x104   :  { %2088 = vmatpush1.bf16.msra.mxu0 %v4185_v8  ;;  %2280 = vmatpush1.bf16.msra.mxu1 %v4186_v48 }
 0x105   :  { %2090 = vmatprep.subr.bf16.mxu0 %v4187_v58  ;;  %2282 = vmatprep.subr.bf16.mxu1 %v4188_v16 }
 0x106   :  { %884 = vmatprep.mubr.f32.mxu0 %v4044_v32  ;;  %1788 = vmatprep.mubr.f32.mxu1 %v4044_v32 }
 0x108   :  { %2092 = vmatpush1.bf16.msra.mxu0 %v4189_v33  ;;  %2284 = vmatpush1.bf16.msra.mxu1 %v4190_v22 }
 0x109   :  { %2094 = vmatprep.subr.bf16.mxu0 %v4191_v28  ;;  %2286 = vmatprep.subr.bf16.mxu1 %v4192_v26 }
 0x10c   :  { %2096 = vmatpush1.bf16.msra.mxu0 %v4193_v25  ;;  %2288 = vmatpush1.bf16.msra.mxu1 %v4194_v43 }
 0x10d   :  { %2098 = vmatprep.subr.bf16.mxu0 %v4195_v39  ;;  %2290 = vmatprep.subr.bf16.mxu1 %v4196_v5 }
 0x110   :  { %2100 = vmatpush1.bf16.msra.mxu0 %v4197_v37  ;;  %2292 = vmatpush1.bf16.msra.mxu1 %v4198_v36 }
 0x111   :  { %2102 = vmatprep.subr.bf16.mxu0 %v4199_v42  ;;  %2294 = vmatprep.subr.bf16.mxu1 %v4200_v7 }
 0x114   :  { %2104 = vmatpush1.bf16.msra.mxu0 %v4201_v62  ;;  %2296 = vmatpush1.bf16.msra.mxu1 %v4202_v38 }
 0x115   :  { %2106 = vmatprep.subr.bf16.mxu0 %v4203_v41  ;;  %2298 = vmatprep.subr.bf16.mxu1 %v4204_v0 }
 0x118   :  { %2108 = vmatpush1.bf16.msra.mxu0 %v4205_v20  ;;  %2300 = vmatpush1.bf16.msra.mxu1 %v4206_v18 }
 0x119   :  { %2110 = vmatprep.subr.bf16.mxu0 %v4207_v1  ;;  %2302 = vmatprep.subr.bf16.mxu1 %v4208_v34 }
 0x11c   :  { %2112 = vmatpush1.bf16.msra.mxu0 %v4209_v56  ;;  %2304 = vmatpush1.bf16.msra.mxu1 %v4210_v61 }
 0x11d   :  { %2114 = vmatprep.subr.bf16.mxu0 %v4145_v57  ;;  %2306 = vmatprep.subr.bf16.mxu1 %v4146_v6 }
 0x11f   :  { %1943 = vmatmul.mubr.msk.f32.vlgmr.msra.gmra.mrb[0].mxu0 %vm3232_vm0, %v2438_v40  ;;  %1949 = vmatmul.mubr.msk.f32.vlgmr.msra.gmra.mrb[0].mxu1 %vm3232_vm0, %v2438_v40 }
 0x120   :  { %2116 = vmatpush1.bf16.msra.mxu0 %v4147_v21  ;;  %2308 = vmatpush1.bf16.msra.mxu1 %v4148_v24 }
 0x121   :  { %891 = vmatprep.mubr.f32.mxu0 %v4044_v32  ;;  %1795 = vmatprep.mubr.f32.mxu1 %v4044_v32 }
 0x122   :  { %2118 = vmatprep.subr.bf16.mxu0 %v4149_v27  ;;  %2310 = vmatprep.subr.bf16.mxu1 %v4150_v52 }
 0x123   :  { %1944 = vmatmul.mubr.msk.f32.gmra.mrb[2].mxu0 %vm3265_vm1, %v2438_v40  ;;  %1950 = vmatmul.mubr.msk.f32.gmra.mrb[2].mxu1 %vm3265_vm1, %v2438_v40 }
 0x124   :  { %2120 = vmatpush1.bf16.msra.mxu0 %v4151_v4  ;;  %2312 = vmatpush1.bf16.msra.mxu1 %v4152_v55 }
 0x125   :  { %2122 = vmatprep.subr.bf16.mxu0 %v4153_v3  ;;  %2314 = vmatprep.subr.bf16.mxu1 %v4154_v50 }
 0x126   :  { %995 = vmatprep.mubr.f32.mxu0 %v4044_v32  ;;  %1899 = vmatprep.mubr.f32.mxu1 %v4044_v32 }
 0x128   :  { %2124 = vmatpush1.bf16.msra.mxu0 %v4155_v15  ;;  %2316 = vmatpush1.bf16.msra.mxu1 %v4156_v30 }
 0x129   :  { %2126 = vmatprep.subr.bf16.mxu0 %v4157_v13  ;;  %2318 = vmatprep.subr.bf16.mxu1 %v4158_v12 }
 0x12c   :  { %2128 = vmatpush1.bf16.msra.mxu0 %v4159_v19  ;;  %2320 = vmatpush1.bf16.msra.mxu1 %v4160_v44 }
 0x12d   :  { %2130 = vmatprep.subr.bf16.mxu0 %v4161_v23  ;;  %2322 = vmatprep.subr.bf16.mxu1 %v4162_v29 }
 0x130   :  { %2132 = vmatpush1.bf16.msra.mxu0 %v4163_v63  ;;  %2324 = vmatpush1.bf16.msra.mxu1 %v4164_v31 }
 0x131   :  { %2134 = vmatprep.subr.bf16.mxu0 %v4165_v35  ;;  %2326 = vmatprep.subr.bf16.mxu1 %v4166_v45 }
 0x134   :  { %2136 = vmatpush1.bf16.msra.mxu0 %v4167_v47  ;;  %2328 = vmatpush1.bf16.msra.mxu1 %v4168_v51 }
 0x135   :  { %2138 = vmatprep.subr.bf16.mxu0 %v4169_v53  ;;  %2330 = vmatprep.subr.bf16.mxu1 %v4170_v54 }
 0x138   :  { %2140 = vmatpush1.bf16.msra.mxu0 %v4171_v59  ;;  %2332 = vmatpush1.bf16.msra.mxu1 %v4172_v60 }
 0x139   :  { %2142 = vmatprep.subr.bf16.mxu0 %v4173_v2  ;;  %2334 = vmatprep.subr.bf16.mxu1 %v4174_v9 }
 0x13c   :  { %2144 = vmatpush1.bf16.msra.mxu0 %v4175_v11  ;;  %2336 = vmatpush1.bf16.msra.mxu1 %v4176_v17 }
 0x13f   :  { %1945 = vmatmul.mubr.msk.f32.vlgmr.msra.gmra.mrb[0].mxu0 %vm3232_vm0, %v2438_v40  ;;  %1951 = vmatmul.mubr.msk.f32.vlgmr.msra.gmra.mrb[0].mxu1 %vm3232_vm0, %v2438_v40 }
 0x140   :  { %1002 = vmatprep.mubr.f32.mxu0 %v4044_v32  ;;  %1906 = vmatprep.mubr.f32.mxu1 %v4044_v32 }
 0x143   :  { %1946 = vmatmul.mubr.msk.f32.gmra.mrb[2].mxu0 %vm3265_vm1, %v2438_v40  ;;  %1952 = vmatmul.mubr.msk.f32.gmra.mrb[2].mxu1 %vm3265_vm1, %v2438_v40 }
 0x212   :  { %v998_v57 = vpop.f32.mrb[0].mxu0  ;;  %v1902_v6 = vpop.f32.mrb[0].mxu1 }
 0x213   :  { %1914 = vst [vmem:[#allocation5] sm:$0xff] %v998_v57  ;;  %1916 = vst [vmem:[#allocation5 + $0x10] sm:$0xff] %v1902_v6  ;;  %v1000_v21 = vpop.f32.mrb[1].mxu0  ;;  %v1904_v24 = vpop.f32.mrb[1].mxu1 }
 0x214   :  { %1915 = vst [vmem:[#allocation5 + $0x8] sm:$0xff] %v1000_v21  ;;  %1917 = vst [vmem:[#allocation5 + $0x18] sm:$0xff] %v1904_v24 }
 0x216   :  { %v1005_v14 = vpop.f32.mrb[2].mxu0  ;;  %v1909_v32 = vpop.f32.mrb[2].mxu1 }
 0x217   :  { %1918 = vst [vmem:[#allocation5 + $0x20] sm:$0xff] %v1005_v14  ;;  %1920 = vst [vmem:[#allocation5 + $0x30] sm:$0xff] %v1909_v32  ;;  %v1007_v27 = vpop.f32.mrb[3].mxu0  ;;  %v1911_v52 = vpop.f32.mrb[3].mxu1 }
 0x218   :  { %1919 = vst [vmem:[#allocation5 + $0x28] sm:$0xff] %v1007_v27  ;;  %1921 = vst [vmem:[#allocation5 + $0x38] sm:$0xff] %v1911_v52 }
 0x219   :  { %2418 = shalt.err (!%p2415_p12)
}
 0x21a   :  { %s2419_s30 = scalar_lea.hbm %s3607_s2, 1024 }
 0x21b   :  { %p2420_p13 = scmp.ne.s32.totalorder %s3607_s2, %s2419_s30  ;;  %p2423_p0 = scmp.lt.u32.totalorder %s2419_s30, %s3607_s2 }
 0x21d   :  { %p2425_p1 = pnand %p2423_p0, %p2420_p13 }
 0x21f   :  { %2428 = shalt.err (!%p2425_p1)
}
 0x220   :  { %1933 = dma.vmem_to_hbm [thread:$0]  %s1928_s1, 1024, %s3607_s2, [#allocation4], %s2434_s19, %s2434_s19, %s2435_s20  }
 0x221   :  { %2431 = dma.done.wait [#allocation4], 1024  }
 0x222   :  { %2432 = vsyncadd [#allocation4], 4294966272 }
 0x223   :  { %1937 = vsyncpa [#allocation3], 1 }
 0x224   :  { %1938 = vsyncpa [#allocation4], 1 }

</bundles_post_ra>
